<compile_context>
chip_gen: v5e
topology: v5e:2x2
jax: 0.10.0
libtpu: 0.0.40
codegen_flags: <defaults>
</compile_context>

<pallas_src>
import jax
import jax.numpy as jnp
from jax.experimental import pallas as pl
from jax.experimental.pallas import tpu as pltpu

NUM_LAYERS = 3


def _encoder_kernel(x_ref,
                    w_ih0_ref, w_hh0_ref, b0_ref,
                    w_ih1_ref, w_hh1_ref, b1_ref,
                    w_ih2_ref, w_hh2_ref, b2_ref,
                    y_ref, h_out_ref, c_out_ref):
    H = w_hh0_ref.shape[0]
    T = x_ref.shape[0]

    def run_layer(layer_in, w_ih, w_hh, b):
        # w_ih: (in_dim, 4H), w_hh: (H, 4H), b: (1, 4H)
        # Gate column order is [i, f, o, g] (pre-permuted in the wrapper).

        # Input projection for all timesteps at once: one MXU matmul.
        xg = jnp.dot(layer_in, w_ih, preferred_element_type=jnp.float32) + b

        # Zero initial state (matches torch.zeros init in the module), kept in vregs.
        h = jnp.zeros((1, H), jnp.float32)
        c = jnp.zeros((1, H), jnp.float32)

        hs = []
        for t in range(T):  # fully unrolled: T is static and small
            gates = xg[t:t + 1, :] + jnp.dot(
                h, w_hh, preferred_element_type=jnp.float32)
            # One sigmoid over the 3 sigmoid gates, one tanh over the cell gate.
            sig = jax.nn.sigmoid(gates[:, 0:3 * H])
            g_g = jnp.tanh(gates[:, 3 * H:4 * H])
            i_g = sig[:, 0 * H:1 * H]
            f_g = sig[:, 1 * H:2 * H]
            o_g = sig[:, 2 * H:3 * H]

            c = f_g * c + i_g * g_g
            h = o_g * jnp.tanh(c)
            hs.append(h)

        # Single (T, H) flush for the layer output instead of per-step masked stores.
        return jnp.concatenate(hs, axis=0), h, c

    y0, h0, c0 = run_layer(x_ref[...], w_ih0_ref[...], w_hh0_ref[...], b0_ref[...])
    y1, h1, c1 = run_layer(y0, w_ih1_ref[...], w_hh1_ref[...], b1_ref[...])
    y2, h2, c2 = run_layer(y1, w_ih2_ref[...], w_hh2_ref[...], b2_ref[...])

    y_ref[...] = y2
    h_out_ref[...] = jnp.concatenate([h0, h1, h2], axis=0)
    c_out_ref[...] = jnp.concatenate([c0, c1, c2], axis=0)


def init_encoder_params(key, n_features, embedding_dim, num_layers=NUM_LAYERS):
    """PyTorch-style LSTM init (uniform(-k, k), k = 1/sqrt(H)), PyTorch layout.

    Returns per-layer (w_ih (4H, in), w_hh (4H, H), b_ih (4H,), b_hh (4H,)),
    gate order [i, f, g, o] — exactly what nn.LSTM stores.
    """
    H = embedding_dim
    k = 1.0 / jnp.sqrt(jnp.float32(H))
    params = []
    for layer in range(num_layers):
        in_dim = n_features if layer == 0 else H
        key, k1, k2, k3, k4 = jax.random.split(key, 5)
        w_ih = jax.random.uniform(k1, (4 * H, in_dim), jnp.float32, -k, k)
        w_hh = jax.random.uniform(k2, (4 * H, H), jnp.float32, -k, k)
        b_ih = jax.random.uniform(k3, (4 * H,), jnp.float32, -k, k)
        b_hh = jax.random.uniform(k4, (4 * H,), jnp.float32, -k, k)
        params.append((w_ih, w_hh, b_ih, b_hh))
    return params


def _permute_gates(w_4h_major):
    """Reorder gate blocks along axis 0 from PyTorch [i, f, g, o] to [i, f, o, g]."""
    i, f, g, o = jnp.split(w_4h_major, 4, axis=0)
    return jnp.concatenate([i, f, o, g], axis=0)


def prepare_encoder_params(torch_params):
    """Wrapper-side layout plumbing (done once, outside the kernel):

    * transpose weights so the kernel never runs an XLU transpose,
    * permute gate columns to [i, f, o, g] so sigmoid/tanh each cover one slice,
    * fold b_ih + b_hh into a single (1, 4H) row.
    """
    prepared = []
    for (w_ih, w_hh, b_ih, b_hh) in torch_params:
        H4 = w_ih.shape[0]
        w_ih_t = _permute_gates(w_ih).T            # (in_dim, 4H)
        w_hh_t = _permute_gates(w_hh).T            # (H, 4H)
        b = _permute_gates((b_ih + b_hh).reshape(H4, 1)).reshape(1, H4)
        prepared.append((w_ih_t, w_hh_t, b))
    return prepared


def encoder_forward(x, prepared_params, seq_len, n_features):
    """Reproduces Encoder.forward: returns (output, hidden, cell).

    output: (1, seq_len, H)   — top-layer hidden state for every time step
    hidden: (num_layers, 1, H)
    cell:   (num_layers, 1, H)
    """
    assert len(prepared_params) == NUM_LAYERS
    x2d = x.reshape(seq_len, n_features).astype(jnp.float32)
    H = prepared_params[0][1].shape[0]
    T = seq_len
    flat = [p for layer_params in prepared_params for p in layer_params]

    vmem = pl.BlockSpec(memory_space=pltpu.MemorySpace.VMEM)
    y, h_fin, c_fin = pl.pallas_call(
        _encoder_kernel,
        out_shape=(
            jax.ShapeDtypeStruct((T, H), jnp.float32),
            jax.ShapeDtypeStruct((NUM_LAYERS, H), jnp.float32),
            jax.ShapeDtypeStruct((NUM_LAYERS, H), jnp.float32),
        ),
        in_specs=[vmem] * (1 + len(flat)),
        out_specs=(vmem, vmem, vmem),
    )(x2d, *flat)

    output = y[None, :, :]          # (1, T, H)
    hidden = h_fin[:, None, :]      # (num_layers, 1, H)
    cell = c_fin[:, None, :]        # (num_layers, 1, H)
    return output, hidden, cell


def _reference_lstm_layer(x, w_ih, w_hh, b_ih, b_hh):
    """Pure-JAX reference using the *raw PyTorch-layout* weights ([i,f,g,o] rows)."""
    H = w_hh.shape[1]

    def step(carry, x_t):
        h, c = carry
        gates = x_t @ w_ih.T + h @ w_hh.T + b_ih + b_hh
        i = jax.nn.sigmoid(gates[0 * H:1 * H])
        f = jax.nn.sigmoid(gates[1 * H:2 * H])
        g = jnp.tanh(gates[2 * H:3 * H])
        o = jax.nn.sigmoid(gates[3 * H:4 * H])
        c_new = f * c + i * g
        h_new = o * jnp.tanh(c_new)
        return (h_new, c_new), h_new

    (h_fin, c_fin), ys = jax.lax.scan(
        step, (jnp.zeros(H, jnp.float32), jnp.zeros(H, jnp.float32)), x)
    return ys, h_fin, c_fin


if __name__ == "__main__":
    seq_len, n_features, embedding_dim = 8, 4, 32

    key = jax.random.PRNGKey(0)
    key, pkey, xkey = jax.random.split(key, 3)
    torch_params = init_encoder_params(pkey, n_features, embedding_dim)
    prepared_params = prepare_encoder_params(torch_params)

    # Input consistent with the module: anything reshapeable to (1, seq_len, n_features).
    x = jax.random.normal(xkey, (seq_len, n_features), jnp.float32)

    out, hidden, cell = encoder_forward(x, prepared_params, seq_len, n_features)
    jax.block_until_ready((out, hidden, cell))

    # Shape check against the PyTorch module's outputs.
    assert out.shape == (1, seq_len, embedding_dim)
    assert hidden.shape == (NUM_LAYERS, 1, embedding_dim)
    assert cell.shape == (NUM_LAYERS, 1, embedding_dim)

    # Numerical check against a pure-JAX reference LSTM stack built from the
    # raw PyTorch-layout weights (validates the transpose + gate permutation).
    layer_in = x.astype(jnp.float32)
    h_ref, c_ref = [], []
    for (w_ih, w_hh, b_ih, b_hh) in torch_params:
        layer_in, hf, cf = _reference_lstm_layer(layer_in, w_ih, w_hh, b_ih, b_hh)
        h_ref.append(hf)
        c_ref.append(cf)
    out_ref = layer_in[None, :, :]
    hidden_ref = jnp.stack(h_ref, axis=0)[:, None, :]
    cell_ref = jnp.stack(c_ref, axis=0)[:, None, :]

    assert jnp.allclose(out, out_ref, atol=1e-5, rtol=1e-5)
    assert jnp.allclose(hidden, hidden_ref, atol=1e-5, rtol=1e-5)
    assert jnp.allclose(cell, cell_ref, atol=1e-5, rtol=1e-5)

    print("KERNEL_OK")
</pallas_src>

<mosaic_0001>
module attributes {stable_mosaic.version = 11 : i64} {
  func.func @_encoder_kernel(%arg0: memref<8x4xf32, #tpu.memory_space<vmem>>, %arg1: memref<4x128xf32, #tpu.memory_space<vmem>>, %arg2: memref<32x128xf32, #tpu.memory_space<vmem>>, %arg3: memref<1x128xf32, #tpu.memory_space<vmem>>, %arg4: memref<32x128xf32, #tpu.memory_space<vmem>>, %arg5: memref<32x128xf32, #tpu.memory_space<vmem>>, %arg6: memref<1x128xf32, #tpu.memory_space<vmem>>, %arg7: memref<32x128xf32, #tpu.memory_space<vmem>>, %arg8: memref<32x128xf32, #tpu.memory_space<vmem>>, %arg9: memref<1x128xf32, #tpu.memory_space<vmem>>, %arg10: memref<8x32xf32, #tpu.memory_space<vmem>>, %arg11: memref<3x32xf32, #tpu.memory_space<vmem>>, %arg12: memref<3x32xf32, #tpu.memory_space<vmem>>) attributes {dimension_semantics = [], scalar_prefetch = 0 : i64, scratch_operands = 0 : i64, tpu.core_type = #tpu.core_type<tc>} {
    %c0 = arith.constant 0 : index
    %c0_0 = arith.constant 0 : index
    %0 = vector.load %arg0[%c0, %c0_0] : memref<8x4xf32, #tpu.memory_space<vmem>>, vector<8x4xf32>
    %c0_1 = arith.constant 0 : index
    %c0_2 = arith.constant 0 : index
    %1 = vector.load %arg1[%c0_1, %c0_2] : memref<4x128xf32, #tpu.memory_space<vmem>>, vector<4x128xf32>
    %c0_3 = arith.constant 0 : index
    %c0_4 = arith.constant 0 : index
    %2 = vector.load %arg2[%c0_3, %c0_4] : memref<32x128xf32, #tpu.memory_space<vmem>>, vector<32x128xf32>
    %c0_5 = arith.constant 0 : index
    %c0_6 = arith.constant 0 : index
    %3 = vector.load %arg3[%c0_5, %c0_6] : memref<1x128xf32, #tpu.memory_space<vmem>>, vector<1x128xf32>
    %cst = arith.constant dense<0.000000e+00> : vector<8x128xf32>
    %4 = tpu.matmul %0, %1, %cst {dimension_numbers = #tpu.dot_dimension_numbers<[1], [0], [0], [1], [0, 0, 1, 1], [], []>} : vector<8x4xf32>, vector<4x128xf32>, vector<8x128xf32> -> vector<8x128xf32>
    %5 = vector.broadcast %3 : vector<1x128xf32> to vector<8x128xf32>
    %6 = arith.addf %4, %5 : vector<8x128xf32>
    %cst_7 = arith.constant 0.000000e+00 : f32
    %7 = vector.broadcast %cst_7 : f32 to vector<1x32xf32>
    %cst_8 = arith.constant 0.000000e+00 : f32
    %8 = vector.broadcast %cst_8 : f32 to vector<1x32xf32>
    %9 = vector.extract_strided_slice %6 {offsets = [0, 0], sizes = [1, 128], strides = [1, 1]} : vector<8x128xf32> to vector<1x128xf32>
    %cst_9 = arith.constant dense<0.000000e+00> : vector<1x128xf32>
    %10 = tpu.matmul %7, %2, %cst_9 {dimension_numbers = #tpu.dot_dimension_numbers<[1], [0], [0], [1], [0, 0, 1, 1], [], []>} : vector<1x32xf32>, vector<32x128xf32>, vector<1x128xf32> -> vector<1x128xf32>
    %11 = arith.addf %9, %10 : vector<1x128xf32>
    %12 = vector.extract_strided_slice %11 {offsets = [0, 0], sizes = [1, 96], strides = [1, 1]} : vector<1x128xf32> to vector<1x96xf32>
    %13 = arith.negf %12 : vector<1x96xf32>
    %14 = math.exp %13 : vector<1x96xf32>
    %cst_10 = arith.constant 1.000000e+00 : f32
    %15 = vector.broadcast %cst_10 : f32 to vector<1x96xf32>
    %16 = arith.addf %15, %14 : vector<1x96xf32>
    %17 = arith.divf %15, %16 : vector<1x96xf32>
    %18 = vector.extract_strided_slice %11 {offsets = [0, 96], sizes = [1, 32], strides = [1, 1]} : vector<1x128xf32> to vector<1x32xf32>
    %19 = math.tanh %18 : vector<1x32xf32>
    %20 = vector.extract_strided_slice %17 {offsets = [0, 0], sizes = [1, 32], strides = [1, 1]} : vector<1x96xf32> to vector<1x32xf32>
    %21 = vector.extract_strided_slice %17 {offsets = [0, 32], sizes = [1, 32], strides = [1, 1]} : vector<1x96xf32> to vector<1x32xf32>
    %22 = vector.extract_strided_slice %17 {offsets = [0, 64], sizes = [1, 32], strides = [1, 1]} : vector<1x96xf32> to vector<1x32xf32>
    %23 = arith.mulf %21, %8 : vector<1x32xf32>
    %24 = arith.mulf %20, %19 : vector<1x32xf32>
    %25 = arith.addf %23, %24 : vector<1x32xf32>
    %26 = math.tanh %25 : vector<1x32xf32>
    %27 = arith.mulf %22, %26 : vector<1x32xf32>
    %28 = vector.extract_strided_slice %6 {offsets = [1, 0], sizes = [1, 128], strides = [1, 1]} : vector<8x128xf32> to vector<1x128xf32>
    %cst_11 = arith.constant dense<0.000000e+00> : vector<1x128xf32>
    %29 = tpu.matmul %27, %2, %cst_11 {dimension_numbers = #tpu.dot_dimension_numbers<[1], [0], [0], [1], [0, 0, 1, 1], [], []>} : vector<1x32xf32>, vector<32x128xf32>, vector<1x128xf32> -> vector<1x128xf32>
    %30 = arith.addf %28, %29 : vector<1x128xf32>
    %31 = vector.extract_strided_slice %30 {offsets = [0, 0], sizes = [1, 96], strides = [1, 1]} : vector<1x128xf32> to vector<1x96xf32>
    %32 = arith.negf %31 : vector<1x96xf32>
    %33 = math.exp %32 : vector<1x96xf32>
    %cst_12 = arith.constant 1.000000e+00 : f32
    %34 = vector.broadcast %cst_12 : f32 to vector<1x96xf32>
    %35 = arith.addf %34, %33 : vector<1x96xf32>
    %36 = arith.divf %34, %35 : vector<1x96xf32>
    %37 = vector.extract_strided_slice %30 {offsets = [0, 96], sizes = [1, 32], strides = [1, 1]} : vector<1x128xf32> to vector<1x32xf32>
    %38 = math.tanh %37 : vector<1x32xf32>
    %39 = vector.extract_strided_slice %36 {offsets = [0, 0], sizes = [1, 32], strides = [1, 1]} : vector<1x96xf32> to vector<1x32xf32>
    %40 = vector.extract_strided_slice %36 {offsets = [0, 32], sizes = [1, 32], strides = [1, 1]} : vector<1x96xf32> to vector<1x32xf32>
    %41 = vector.extract_strided_slice %36 {offsets = [0, 64], sizes = [1, 32], strides = [1, 1]} : vector<1x96xf32> to vector<1x32xf32>
    %42 = arith.mulf %40, %25 : vector<1x32xf32>
    %43 = arith.mulf %39, %38 : vector<1x32xf32>
    %44 = arith.addf %42, %43 : vector<1x32xf32>
    %45 = math.tanh %44 : vector<1x32xf32>
    %46 = arith.mulf %41, %45 : vector<1x32xf32>
    %47 = vector.extract_strided_slice %6 {offsets = [2, 0], sizes = [1, 128], strides = [1, 1]} : vector<8x128xf32> to vector<1x128xf32>
    %cst_13 = arith.constant dense<0.000000e+00> : vector<1x128xf32>
    %48 = tpu.matmul %46, %2, %cst_13 {dimension_numbers = #tpu.dot_dimension_numbers<[1], [0], [0], [1], [0, 0, 1, 1], [], []>} : vector<1x32xf32>, vector<32x128xf32>, vector<1x128xf32> -> vector<1x128xf32>
    %49 = arith.addf %47, %48 : vector<1x128xf32>
    %50 = vector.extract_strided_slice %49 {offsets = [0, 0], sizes = [1, 96], strides = [1, 1]} : vector<1x128xf32> to vector<1x96xf32>
    %51 = arith.negf %50 : vector<1x96xf32>
    %52 = math.exp %51 : vector<1x96xf32>
    %cst_14 = arith.constant 1.000000e+00 : f32
    %53 = vector.broadcast %cst_14 : f32 to vector<1x96xf32>
    %54 = arith.addf %53, %52 : vector<1x96xf32>
    %55 = arith.divf %53, %54 : vector<1x96xf32>
    %56 = vector.extract_strided_slice %49 {offsets = [0, 96], sizes = [1, 32], strides = [1, 1]} : vector<1x128xf32> to vector<1x32xf32>
    %57 = math.tanh %56 : vector<1x32xf32>
    %58 = vector.extract_strided_slice %55 {offsets = [0, 0], sizes = [1, 32], strides = [1, 1]} : vector<1x96xf32> to vector<1x32xf32>
    %59 = vector.extract_strided_slice %55 {offsets = [0, 32], sizes = [1, 32], strides = [1, 1]} : vector<1x96xf32> to vector<1x32xf32>
    %60 = vector.extract_strided_slice %55 {offsets = [0, 64], sizes = [1, 32], strides = [1, 1]} : vector<1x96xf32> to vector<1x32xf32>
    %61 = arith.mulf %59, %44 : vector<1x32xf32>
    %62 = arith.mulf %58, %57 : vector<1x32xf32>
    %63 = arith.addf %61, %62 : vector<1x32xf32>
    %64 = math.tanh %63 : vector<1x32xf32>
    %65 = arith.mulf %60, %64 : vector<1x32xf32>
    %66 = vector.extract_strided_slice %6 {offsets = [3, 0], sizes = [1, 128], strides = [1, 1]} : vector<8x128xf32> to vector<1x128xf32>
    %cst_15 = arith.constant dense<0.000000e+00> : vector<1x128xf32>
    %67 = tpu.matmul %65, %2, %cst_15 {dimension_numbers = #tpu.dot_dimension_numbers<[1], [0], [0], [1], [0, 0, 1, 1], [], []>} : vector<1x32xf32>, vector<32x128xf32>, vector<1x128xf32> -> vector<1x128xf32>
    %68 = arith.addf %66, %67 : vector<1x128xf32>
    %69 = vector.extract_strided_slice %68 {offsets = [0, 0], sizes = [1, 96], strides = [1, 1]} : vector<1x128xf32> to vector<1x96xf32>
    %70 = arith.negf %69 : vector<1x96xf32>
    %71 = math.exp %70 : vector<1x96xf32>
    %cst_16 = arith.constant 1.000000e+00 : f32
    %72 = vector.broadcast %cst_16 : f32 to vector<1x96xf32>
    %73 = arith.addf %72, %71 : vector<1x96xf32>
    %74 = arith.divf %72, %73 : vector<1x96xf32>
    %75 = vector.extract_strided_slice %68 {offsets = [0, 96], sizes = [1, 32], strides = [1, 1]} : vector<1x128xf32> to vector<1x32xf32>
    %76 = math.tanh %75 : vector<1x32xf32>
    %77 = vector.extract_strided_slice %74 {offsets = [0, 0], sizes = [1, 32], strides = [1, 1]} : vector<1x96xf32> to vector<1x32xf32>
    %78 = vector.extract_strided_slice %74 {offsets = [0, 32], sizes = [1, 32], strides = [1, 1]} : vector<1x96xf32> to vector<1x32xf32>
    %79 = vector.extract_strided_slice %74 {offsets = [0, 64], sizes = [1, 32], strides = [1, 1]} : vector<1x96xf32> to vector<1x32xf32>
    %80 = arith.mulf %78, %63 : vector<1x32xf32>
    %81 = arith.mulf %77, %76 : vector<1x32xf32>
    %82 = arith.addf %80, %81 : vector<1x32xf32>
    %83 = math.tanh %82 : vector<1x32xf32>
    %84 = arith.mulf %79, %83 : vector<1x32xf32>
    %85 = vector.extract_strided_slice %6 {offsets = [4, 0], sizes = [1, 128], strides = [1, 1]} : vector<8x128xf32> to vector<1x128xf32>
    %cst_17 = arith.constant dense<0.000000e+00> : vector<1x128xf32>
    %86 = tpu.matmul %84, %2, %cst_17 {dimension_numbers = #tpu.dot_dimension_numbers<[1], [0], [0], [1], [0, 0, 1, 1], [], []>} : vector<1x32xf32>, vector<32x128xf32>, vector<1x128xf32> -> vector<1x128xf32>
    %87 = arith.addf %85, %86 : vector<1x128xf32>
    %88 = vector.extract_strided_slice %87 {offsets = [0, 0], sizes = [1, 96], strides = [1, 1]} : vector<1x128xf32> to vector<1x96xf32>
    %89 = arith.negf %88 : vector<1x96xf32>
    %90 = math.exp %89 : vector<1x96xf32>
    %cst_18 = arith.constant 1.000000e+00 : f32
    %91 = vector.broadcast %cst_18 : f32 to vector<1x96xf32>
    %92 = arith.addf %91, %90 : vector<1x96xf32>
    %93 = arith.divf %91, %92 : vector<1x96xf32>
    %94 = vector.extract_strided_slice %87 {offsets = [0, 96], sizes = [1, 32], strides = [1, 1]} : vector<1x128xf32> to vector<1x32xf32>
    %95 = math.tanh %94 : vector<1x32xf32>
    %96 = vector.extract_strided_slice %93 {offsets = [0, 0], sizes = [1, 32], strides = [1, 1]} : vector<1x96xf32> to vector<1x32xf32>
    %97 = vector.extract_strided_slice %93 {offsets = [0, 32], sizes = [1, 32], strides = [1, 1]} : vector<1x96xf32> to vector<1x32xf32>
    %98 = vector.extract_strided_slice %93 {offsets = [0, 64], sizes = [1, 32], strides = [1, 1]} : vector<1x96xf32> to vector<1x32xf32>
    %99 = arith.mulf %97, %82 : vector<1x32xf32>
    %100 = arith.mulf %96, %95 : vector<1x32xf32>
    %101 = arith.addf %99, %100 : vector<1x32xf32>
    %102 = math.tanh %101 : vector<1x32xf32>
    %103 = arith.mulf %98, %102 : vector<1x32xf32>
    %104 = vector.extract_strided_slice %6 {offsets = [5, 0], sizes = [1, 128], strides = [1, 1]} : vector<8x128xf32> to vector<1x128xf32>
    %cst_19 = arith.constant dense<0.000000e+00> : vector<1x128xf32>
    %105 = tpu.matmul %103, %2, %cst_19 {dimension_numbers = #tpu.dot_dimension_numbers<[1], [0], [0], [1], [0, 0, 1, 1], [], []>} : vector<1x32xf32>, vector<32x128xf32>, vector<1x128xf32> -> vector<1x128xf32>
    %106 = arith.addf %104, %105 : vector<1x128xf32>
    %107 = vector.extract_strided_slice %106 {offsets = [0, 0], sizes = [1, 96], strides = [1, 1]} : vector<1x128xf32> to vector<1x96xf32>
    %108 = arith.negf %107 : vector<1x96xf32>
    %109 = math.exp %108 : vector<1x96xf32>
    %cst_20 = arith.constant 1.000000e+00 : f32
    %110 = vector.broadcast %cst_20 : f32 to vector<1x96xf32>
    %111 = arith.addf %110, %109 : vector<1x96xf32>
    %112 = arith.divf %110, %111 : vector<1x96xf32>
    %113 = vector.extract_strided_slice %106 {offsets = [0, 96], sizes = [1, 32], strides = [1, 1]} : vector<1x128xf32> to vector<1x32xf32>
    %114 = math.tanh %113 : vector<1x32xf32>
    %115 = vector.extract_strided_slice %112 {offsets = [0, 0], sizes = [1, 32], strides = [1, 1]} : vector<1x96xf32> to vector<1x32xf32>
    %116 = vector.extract_strided_slice %112 {offsets = [0, 32], sizes = [1, 32], strides = [1, 1]} : vector<1x96xf32> to vector<1x32xf32>
    %117 = vector.extract_strided_slice %112 {offsets = [0, 64], sizes = [1, 32], strides = [1, 1]} : vector<1x96xf32> to vector<1x32xf32>
    %118 = arith.mulf %116, %101 : vector<1x32xf32>
    %119 = arith.mulf %115, %114 : vector<1x32xf32>
    %120 = arith.addf %118, %119 : vector<1x32xf32>
    %121 = math.tanh %120 : vector<1x32xf32>
    %122 = arith.mulf %117, %121 : vector<1x32xf32>
    %123 = vector.extract_strided_slice %6 {offsets = [6, 0], sizes = [1, 128], strides = [1, 1]} : vector<8x128xf32> to vector<1x128xf32>
    %cst_21 = arith.constant dense<0.000000e+00> : vector<1x128xf32>
    %124 = tpu.matmul %122, %2, %cst_21 {dimension_numbers = #tpu.dot_dimension_numbers<[1], [0], [0], [1], [0, 0, 1, 1], [], []>} : vector<1x32xf32>, vector<32x128xf32>, vector<1x128xf32> -> vector<1x128xf32>
    %125 = arith.addf %123, %124 : vector<1x128xf32>
    %126 = vector.extract_strided_slice %125 {offsets = [0, 0], sizes = [1, 96], strides = [1, 1]} : vector<1x128xf32> to vector<1x96xf32>
    %127 = arith.negf %126 : vector<1x96xf32>
    %128 = math.exp %127 : vector<1x96xf32>
    %cst_22 = arith.constant 1.000000e+00 : f32
    %129 = vector.broadcast %cst_22 : f32 to vector<1x96xf32>
    %130 = arith.addf %129, %128 : vector<1x96xf32>
    %131 = arith.divf %129, %130 : vector<1x96xf32>
    %132 = vector.extract_strided_slice %125 {offsets = [0, 96], sizes = [1, 32], strides = [1, 1]} : vector<1x128xf32> to vector<1x32xf32>
    %133 = math.tanh %132 : vector<1x32xf32>
    %134 = vector.extract_strided_slice %131 {offsets = [0, 0], sizes = [1, 32], strides = [1, 1]} : vector<1x96xf32> to vector<1x32xf32>
    %135 = vector.extract_strided_slice %131 {offsets = [0, 32], sizes = [1, 32], strides = [1, 1]} : vector<1x96xf32> to vector<1x32xf32>
    %136 = vector.extract_strided_slice %131 {offsets = [0, 64], sizes = [1, 32], strides = [1, 1]} : vector<1x96xf32> to vector<1x32xf32>
    %137 = arith.mulf %135, %120 : vector<1x32xf32>
    %138 = arith.mulf %134, %133 : vector<1x32xf32>
    %139 = arith.addf %137, %138 : vector<1x32xf32>
    %140 = math.tanh %139 : vector<1x32xf32>
    %141 = arith.mulf %136, %140 : vector<1x32xf32>
    %142 = vector.extract_strided_slice %6 {offsets = [7, 0], sizes = [1, 128], strides = [1, 1]} : vector<8x128xf32> to vector<1x128xf32>
    %cst_23 = arith.constant dense<0.000000e+00> : vector<1x128xf32>
    %143 = tpu.matmul %141, %2, %cst_23 {dimension_numbers = #tpu.dot_dimension_numbers<[1], [0], [0], [1], [0, 0, 1, 1], [], []>} : vector<1x32xf32>, vector<32x128xf32>, vector<1x128xf32> -> vector<1x128xf32>
    %144 = arith.addf %142, %143 : vector<1x128xf32>
    %145 = vector.extract_strided_slice %144 {offsets = [0, 0], sizes = [1, 96], strides = [1, 1]} : vector<1x128xf32> to vector<1x96xf32>
    %146 = arith.negf %145 : vector<1x96xf32>
    %147 = math.exp %146 : vector<1x96xf32>
    %cst_24 = arith.constant 1.000000e+00 : f32
    %148 = vector.broadcast %cst_24 : f32 to vector<1x96xf32>
    %149 = arith.addf %148, %147 : vector<1x96xf32>
    %150 = arith.divf %148, %149 : vector<1x96xf32>
    %151 = vector.extract_strided_slice %144 {offsets = [0, 96], sizes = [1, 32], strides = [1, 1]} : vector<1x128xf32> to vector<1x32xf32>
    %152 = math.tanh %151 : vector<1x32xf32>
    %153 = vector.extract_strided_slice %150 {offsets = [0, 0], sizes = [1, 32], strides = [1, 1]} : vector<1x96xf32> to vector<1x32xf32>
    %154 = vector.extract_strided_slice %150 {offsets = [0, 32], sizes = [1, 32], strides = [1, 1]} : vector<1x96xf32> to vector<1x32xf32>
    %155 = vector.extract_strided_slice %150 {offsets = [0, 64], sizes = [1, 32], strides = [1, 1]} : vector<1x96xf32> to vector<1x32xf32>
    %156 = arith.mulf %154, %139 : vector<1x32xf32>
    %157 = arith.mulf %153, %152 : vector<1x32xf32>
    %158 = arith.addf %156, %157 : vector<1x32xf32>
    %159 = math.tanh %158 : vector<1x32xf32>
    %160 = arith.mulf %155, %159 : vector<1x32xf32>
    %161 = tpu.concatenate %27, %46, %65, %84, %103, %122, %141, %160 in 0 : vector<1x32xf32>, vector<1x32xf32>, vector<1x32xf32>, vector<1x32xf32>, vector<1x32xf32>, vector<1x32xf32>, vector<1x32xf32>, vector<1x32xf32> -> vector<8x32xf32>
    %c0_25 = arith.constant 0 : index
    %c0_26 = arith.constant 0 : index
    %162 = vector.load %arg4[%c0_25, %c0_26] : memref<32x128xf32, #tpu.memory_space<vmem>>, vector<32x128xf32>
    %c0_27 = arith.constant 0 : index
    %c0_28 = arith.constant 0 : index
    %163 = vector.load %arg5[%c0_27, %c0_28] : memref<32x128xf32, #tpu.memory_space<vmem>>, vector<32x128xf32>
    %c0_29 = arith.constant 0 : index
    %c0_30 = arith.constant 0 : index
    %164 = vector.load %arg6[%c0_29, %c0_30] : memref<1x128xf32, #tpu.memory_space<vmem>>, vector<1x128xf32>
    %cst_31 = arith.constant dense<0.000000e+00> : vector<8x128xf32>
    %165 = tpu.matmul %161, %162, %cst_31 {dimension_numbers = #tpu.dot_dimension_numbers<[1], [0], [0], [1], [0, 0, 1, 1], [], []>} : vector<8x32xf32>, vector<32x128xf32>, vector<8x128xf32> -> vector<8x128xf32>
    %166 = vector.broadcast %164 : vector<1x128xf32> to vector<8x128xf32>
    %167 = arith.addf %165, %166 : vector<8x128xf32>
    %cst_32 = arith.constant 0.000000e+00 : f32
    %168 = vector.broadcast %cst_32 : f32 to vector<1x32xf32>
    %cst_33 = arith.constant 0.000000e+00 : f32
    %169 = vector.broadcast %cst_33 : f32 to vector<1x32xf32>
    %170 = vector.extract_strided_slice %167 {offsets = [0, 0], sizes = [1, 128], strides = [1, 1]} : vector<8x128xf32> to vector<1x128xf32>
    %cst_34 = arith.constant dense<0.000000e+00> : vector<1x128xf32>
    %171 = tpu.matmul %168, %163, %cst_34 {dimension_numbers = #tpu.dot_dimension_numbers<[1], [0], [0], [1], [0, 0, 1, 1], [], []>} : vector<1x32xf32>, vector<32x128xf32>, vector<1x128xf32> -> vector<1x128xf32>
    %172 = arith.addf %170, %171 : vector<1x128xf32>
    %173 = vector.extract_strided_slice %172 {offsets = [0, 0], sizes = [1, 96], strides = [1, 1]} : vector<1x128xf32> to vector<1x96xf32>
    %174 = arith.negf %173 : vector<1x96xf32>
    %175 = math.exp %174 : vector<1x96xf32>
    %cst_35 = arith.constant 1.000000e+00 : f32
    %176 = vector.broadcast %cst_35 : f32 to vector<1x96xf32>
    %177 = arith.addf %176, %175 : vector<1x96xf32>
    %178 = arith.divf %176, %177 : vector<1x96xf32>
    %179 = vector.extract_strided_slice %172 {offsets = [0, 96], sizes = [1, 32], strides = [1, 1]} : vector<1x128xf32> to vector<1x32xf32>
    %180 = math.tanh %179 : vector<1x32xf32>
    %181 = vector.extract_strided_slice %178 {offsets = [0, 0], sizes = [1, 32], strides = [1, 1]} : vector<1x96xf32> to vector<1x32xf32>
    %182 = vector.extract_strided_slice %178 {offsets = [0, 32], sizes = [1, 32], strides = [1, 1]} : vector<1x96xf32> to vector<1x32xf32>
    %183 = vector.extract_strided_slice %178 {offsets = [0, 64], sizes = [1, 32], strides = [1, 1]} : vector<1x96xf32> to vector<1x32xf32>
    %184 = arith.mulf %182, %169 : vector<1x32xf32>
    %185 = arith.mulf %181, %180 : vector<1x32xf32>
    %186 = arith.addf %184, %185 : vector<1x32xf32>
    %187 = math.tanh %186 : vector<1x32xf32>
    %188 = arith.mulf %183, %187 : vector<1x32xf32>
    %189 = vector.extract_strided_slice %167 {offsets = [1, 0], sizes = [1, 128], strides = [1, 1]} : vector<8x128xf32> to vector<1x128xf32>
    %cst_36 = arith.constant dense<0.000000e+00> : vector<1x128xf32>
    %190 = tpu.matmul %188, %163, %cst_36 {dimension_numbers = #tpu.dot_dimension_numbers<[1], [0], [0], [1], [0, 0, 1, 1], [], []>} : vector<1x32xf32>, vector<32x128xf32>, vector<1x128xf32> -> vector<1x128xf32>
    %191 = arith.addf %189, %190 : vector<1x128xf32>
    %192 = vector.extract_strided_slice %191 {offsets = [0, 0], sizes = [1, 96], strides = [1, 1]} : vector<1x128xf32> to vector<1x96xf32>
    %193 = arith.negf %192 : vector<1x96xf32>
    %194 = math.exp %193 : vector<1x96xf32>
    %cst_37 = arith.constant 1.000000e+00 : f32
    %195 = vector.broadcast %cst_37 : f32 to vector<1x96xf32>
    %196 = arith.addf %195, %194 : vector<1x96xf32>
    %197 = arith.divf %195, %196 : vector<1x96xf32>
    %198 = vector.extract_strided_slice %191 {offsets = [0, 96], sizes = [1, 32], strides = [1, 1]} : vector<1x128xf32> to vector<1x32xf32>
    %199 = math.tanh %198 : vector<1x32xf32>
    %200 = vector.extract_strided_slice %197 {offsets = [0, 0], sizes = [1, 32], strides = [1, 1]} : vector<1x96xf32> to vector<1x32xf32>
    %201 = vector.extract_strided_slice %197 {offsets = [0, 32], sizes = [1, 32], strides = [1, 1]} : vector<1x96xf32> to vector<1x32xf32>
    %202 = vector.extract_strided_slice %197 {offsets = [0, 64], sizes = [1, 32], strides = [1, 1]} : vector<1x96xf32> to vector<1x32xf32>
    %203 = arith.mulf %201, %186 : vector<1x32xf32>
    %204 = arith.mulf %200, %199 : vector<1x32xf32>
    %205 = arith.addf %203, %204 : vector<1x32xf32>
    %206 = math.tanh %205 : vector<1x32xf32>
    %207 = arith.mulf %202, %206 : vector<1x32xf32>
    %208 = vector.extract_strided_slice %167 {offsets = [2, 0], sizes = [1, 128], strides = [1, 1]} : vector<8x128xf32> to vector<1x128xf32>
    %cst_38 = arith.constant dense<0.000000e+00> : vector<1x128xf32>
    %209 = tpu.matmul %207, %163, %cst_38 {dimension_numbers = #tpu.dot_dimension_numbers<[1], [0], [0], [1], [0, 0, 1, 1], [], []>} : vector<1x32xf32>, vector<32x128xf32>, vector<1x128xf32> -> vector<1x128xf32>
    %210 = arith.addf %208, %209 : vector<1x128xf32>
    %211 = vector.extract_strided_slice %210 {offsets = [0, 0], sizes = [1, 96], strides = [1, 1]} : vector<1x128xf32> to vector<1x96xf32>
    %212 = arith.negf %211 : vector<1x96xf32>
    %213 = math.exp %212 : vector<1x96xf32>
    %cst_39 = arith.constant 1.000000e+00 : f32
    %214 = vector.broadcast %cst_39 : f32 to vector<1x96xf32>
    %215 = arith.addf %214, %213 : vector<1x96xf32>
    %216 = arith.divf %214, %215 : vector<1x96xf32>
    %217 = vector.extract_strided_slice %210 {offsets = [0, 96], sizes = [1, 32], strides = [1, 1]} : vector<1x128xf32> to vector<1x32xf32>
    %218 = math.tanh %217 : vector<1x32xf32>
    %219 = vector.extract_strided_slice %216 {offsets = [0, 0], sizes = [1, 32], strides = [1, 1]} : vector<1x96xf32> to vector<1x32xf32>
    %220 = vector.extract_strided_slice %216 {offsets = [0, 32], sizes = [1, 32], strides = [1, 1]} : vector<1x96xf32> to vector<1x32xf32>
    %221 = vector.extract_strided_slice %216 {offsets = [0, 64], sizes = [1, 32], strides = [1, 1]} : vector<1x96xf32> to vector<1x32xf32>
    %222 = arith.mulf %220, %205 : vector<1x32xf32>
    %223 = arith.mulf %219, %218 : vector<1x32xf32>
    %224 = arith.addf %222, %223 : vector<1x32xf32>
    %225 = math.tanh %224 : vector<1x32xf32>
    %226 = arith.mulf %221, %225 : vector<1x32xf32>
    %227 = vector.extract_strided_slice %167 {offsets = [3, 0], sizes = [1, 128], strides = [1, 1]} : vector<8x128xf32> to vector<1x128xf32>
    %cst_40 = arith.constant dense<0.000000e+00> : vector<1x128xf32>
    %228 = tpu.matmul %226, %163, %cst_40 {dimension_numbers = #tpu.dot_dimension_numbers<[1], [0], [0], [1], [0, 0, 1, 1], [], []>} : vector<1x32xf32>, vector<32x128xf32>, vector<1x128xf32> -> vector<1x128xf32>
    %229 = arith.addf %227, %228 : vector<1x128xf32>
    %230 = vector.extract_strided_slice %229 {offsets = [0, 0], sizes = [1, 96], strides = [1, 1]} : vector<1x128xf32> to vector<1x96xf32>
    %231 = arith.negf %230 : vector<1x96xf32>
    %232 = math.exp %231 : vector<1x96xf32>
    %cst_41 = arith.constant 1.000000e+00 : f32
    %233 = vector.broadcast %cst_41 : f32 to vector<1x96xf32>
    %234 = arith.addf %233, %232 : vector<1x96xf32>
    %235 = arith.divf %233, %234 : vector<1x96xf32>
    %236 = vector.extract_strided_slice %229 {offsets = [0, 96], sizes = [1, 32], strides = [1, 1]} : vector<1x128xf32> to vector<1x32xf32>
    %237 = math.tanh %236 : vector<1x32xf32>
    %238 = vector.extract_strided_slice %235 {offsets = [0, 0], sizes = [1, 32], strides = [1, 1]} : vector<1x96xf32> to vector<1x32xf32>
    %239 = vector.extract_strided_slice %235 {offsets = [0, 32], sizes = [1, 32], strides = [1, 1]} : vector<1x96xf32> to vector<1x32xf32>
    %240 = vector.extract_strided_slice %235 {offsets = [0, 64], sizes = [1, 32], strides = [1, 1]} : vector<1x96xf32> to vector<1x32xf32>
    %241 = arith.mulf %239, %224 : vector<1x32xf32>
    %242 = arith.mulf %238, %237 : vector<1x32xf32>
    %243 = arith.addf %241, %242 : vector<1x32xf32>
    %244 = math.tanh %243 : vector<1x32xf32>
    %245 = arith.mulf %240, %244 : vector<1x32xf32>
    %246 = vector.extract_strided_slice %167 {offsets = [4, 0], sizes = [1, 128], strides = [1, 1]} : vector<8x128xf32> to vector<1x128xf32>
    %cst_42 = arith.constant dense<0.000000e+00> : vector<1x128xf32>
    %247 = tpu.matmul %245, %163, %cst_42 {dimension_numbers = #tpu.dot_dimension_numbers<[1], [0], [0], [1], [0, 0, 1, 1], [], []>} : vector<1x32xf32>, vector<32x128xf32>, vector<1x128xf32> -> vector<1x128xf32>
    %248 = arith.addf %246, %247 : vector<1x128xf32>
    %249 = vector.extract_strided_slice %248 {offsets = [0, 0], sizes = [1, 96], strides = [1, 1]} : vector<1x128xf32> to vector<1x96xf32>
    %250 = arith.negf %249 : vector<1x96xf32>
    %251 = math.exp %250 : vector<1x96xf32>
    %cst_43 = arith.constant 1.000000e+00 : f32
    %252 = vector.broadcast %cst_43 : f32 to vector<1x96xf32>
    %253 = arith.addf %252, %251 : vector<1x96xf32>
    %254 = arith.divf %252, %253 : vector<1x96xf32>
    %255 = vector.extract_strided_slice %248 {offsets = [0, 96], sizes = [1, 32], strides = [1, 1]} : vector<1x128xf32> to vector<1x32xf32>
    %256 = math.tanh %255 : vector<1x32xf32>
    %257 = vector.extract_strided_slice %254 {offsets = [0, 0], sizes = [1, 32], strides = [1, 1]} : vector<1x96xf32> to vector<1x32xf32>
    %258 = vector.extract_strided_slice %254 {offsets = [0, 32], sizes = [1, 32], strides = [1, 1]} : vector<1x96xf32> to vector<1x32xf32>
    %259 = vector.extract_strided_slice %254 {offsets = [0, 64], sizes = [1, 32], strides = [1, 1]} : vector<1x96xf32> to vector<1x32xf32>
    %260 = arith.mulf %258, %243 : vector<1x32xf32>
    %261 = arith.mulf %257, %256 : vector<1x32xf32>
    %262 = arith.addf %260, %261 : vector<1x32xf32>
    %263 = math.tanh %262 : vector<1x32xf32>
    %264 = arith.mulf %259, %263 : vector<1x32xf32>
    %265 = vector.extract_strided_slice %167 {offsets = [5, 0], sizes = [1, 128], strides = [1, 1]} : vector<8x128xf32> to vector<1x128xf32>
    %cst_44 = arith.constant dense<0.000000e+00> : vector<1x128xf32>
    %266 = tpu.matmul %264, %163, %cst_44 {dimension_numbers = #tpu.dot_dimension_numbers<[1], [0], [0], [1], [0, 0, 1, 1], [], []>} : vector<1x32xf32>, vector<32x128xf32>, vector<1x128xf32> -> vector<1x128xf32>
    %267 = arith.addf %265, %266 : vector<1x128xf32>
    %268 = vector.extract_strided_slice %267 {offsets = [0, 0], sizes = [1, 96], strides = [1, 1]} : vector<1x128xf32> to vector<1x96xf32>
    %269 = arith.negf %268 : vector<1x96xf32>
    %270 = math.exp %269 : vector<1x96xf32>
    %cst_45 = arith.constant 1.000000e+00 : f32
    %271 = vector.broadcast %cst_45 : f32 to vector<1x96xf32>
    %272 = arith.addf %271, %270 : vector<1x96xf32>
    %273 = arith.divf %271, %272 : vector<1x96xf32>
    %274 = vector.extract_strided_slice %267 {offsets = [0, 96], sizes = [1, 32], strides = [1, 1]} : vector<1x128xf32> to vector<1x32xf32>
    %275 = math.tanh %274 : vector<1x32xf32>
    %276 = vector.extract_strided_slice %273 {offsets = [0, 0], sizes = [1, 32], strides = [1, 1]} : vector<1x96xf32> to vector<1x32xf32>
    %277 = vector.extract_strided_slice %273 {offsets = [0, 32], sizes = [1, 32], strides = [1, 1]} : vector<1x96xf32> to vector<1x32xf32>
    %278 = vector.extract_strided_slice %273 {offsets = [0, 64], sizes = [1, 32], strides = [1, 1]} : vector<1x96xf32> to vector<1x32xf32>
    %279 = arith.mulf %277, %262 : vector<1x32xf32>
    %280 = arith.mulf %276, %275 : vector<1x32xf32>
    %281 = arith.addf %279, %280 : vector<1x32xf32>
    %282 = math.tanh %281 : vector<1x32xf32>
    %283 = arith.mulf %278, %282 : vector<1x32xf32>
    %284 = vector.extract_strided_slice %167 {offsets = [6, 0], sizes = [1, 128], strides = [1, 1]} : vector<8x128xf32> to vector<1x128xf32>
    %cst_46 = arith.constant dense<0.000000e+00> : vector<1x128xf32>
    %285 = tpu.matmul %283, %163, %cst_46 {dimension_numbers = #tpu.dot_dimension_numbers<[1], [0], [0], [1], [0, 0, 1, 1], [], []>} : vector<1x32xf32>, vector<32x128xf32>, vector<1x128xf32> -> vector<1x128xf32>
    %286 = arith.addf %284, %285 : vector<1x128xf32>
    %287 = vector.extract_strided_slice %286 {offsets = [0, 0], sizes = [1, 96], strides = [1, 1]} : vector<1x128xf32> to vector<1x96xf32>
    %288 = arith.negf %287 : vector<1x96xf32>
    %289 = math.exp %288 : vector<1x96xf32>
    %cst_47 = arith.constant 1.000000e+00 : f32
    %290 = vector.broadcast %cst_47 : f32 to vector<1x96xf32>
    %291 = arith.addf %290, %289 : vector<1x96xf32>
    %292 = arith.divf %290, %291 : vector<1x96xf32>
    %293 = vector.extract_strided_slice %286 {offsets = [0, 96], sizes = [1, 32], strides = [1, 1]} : vector<1x128xf32> to vector<1x32xf32>
    %294 = math.tanh %293 : vector<1x32xf32>
    %295 = vector.extract_strided_slice %292 {offsets = [0, 0], sizes = [1, 32], strides = [1, 1]} : vector<1x96xf32> to vector<1x32xf32>
    %296 = vector.extract_strided_slice %292 {offsets = [0, 32], sizes = [1, 32], strides = [1, 1]} : vector<1x96xf32> to vector<1x32xf32>
    %297 = vector.extract_strided_slice %292 {offsets = [0, 64], sizes = [1, 32], strides = [1, 1]} : vector<1x96xf32> to vector<1x32xf32>
    %298 = arith.mulf %296, %281 : vector<1x32xf32>
    %299 = arith.mulf %295, %294 : vector<1x32xf32>
    %300 = arith.addf %298, %299 : vector<1x32xf32>
    %301 = math.tanh %300 : vector<1x32xf32>
    %302 = arith.mulf %297, %301 : vector<1x32xf32>
    %303 = vector.extract_strided_slice %167 {offsets = [7, 0], sizes = [1, 128], strides = [1, 1]} : vector<8x128xf32> to vector<1x128xf32>
    %cst_48 = arith.constant dense<0.000000e+00> : vector<1x128xf32>
    %304 = tpu.matmul %302, %163, %cst_48 {dimension_numbers = #tpu.dot_dimension_numbers<[1], [0], [0], [1], [0, 0, 1, 1], [], []>} : vector<1x32xf32>, vector<32x128xf32>, vector<1x128xf32> -> vector<1x128xf32>
    %305 = arith.addf %303, %304 : vector<1x128xf32>
    %306 = vector.extract_strided_slice %305 {offsets = [0, 0], sizes = [1, 96], strides = [1, 1]} : vector<1x128xf32> to vector<1x96xf32>
    %307 = arith.negf %306 : vector<1x96xf32>
    %308 = math.exp %307 : vector<1x96xf32>
    %cst_49 = arith.constant 1.000000e+00 : f32
    %309 = vector.broadcast %cst_49 : f32 to vector<1x96xf32>
    %310 = arith.addf %309, %308 : vector<1x96xf32>
    %311 = arith.divf %309, %310 : vector<1x96xf32>
    %312 = vector.extract_strided_slice %305 {offsets = [0, 96], sizes = [1, 32], strides = [1, 1]} : vector<1x128xf32> to vector<1x32xf32>
    %313 = math.tanh %312 : vector<1x32xf32>
    %314 = vector.extract_strided_slice %311 {offsets = [0, 0], sizes = [1, 32], strides = [1, 1]} : vector<1x96xf32> to vector<1x32xf32>
    %315 = vector.extract_strided_slice %311 {offsets = [0, 32], sizes = [1, 32], strides = [1, 1]} : vector<1x96xf32> to vector<1x32xf32>
    %316 = vector.extract_strided_slice %311 {offsets = [0, 64], sizes = [1, 32], strides = [1, 1]} : vector<1x96xf32> to vector<1x32xf32>
    %317 = arith.mulf %315, %300 : vector<1x32xf32>
    %318 = arith.mulf %314, %313 : vector<1x32xf32>
    %319 = arith.addf %317, %318 : vector<1x32xf32>
    %320 = math.tanh %319 : vector<1x32xf32>
    %321 = arith.mulf %316, %320 : vector<1x32xf32>
    %322 = tpu.concatenate %188, %207, %226, %245, %264, %283, %302, %321 in 0 : vector<1x32xf32>, vector<1x32xf32>, vector<1x32xf32>, vector<1x32xf32>, vector<1x32xf32>, vector<1x32xf32>, vector<1x32xf32>, vector<1x32xf32> -> vector<8x32xf32>
    %c0_50 = arith.constant 0 : index
    %c0_51 = arith.constant 0 : index
    %323 = vector.load %arg7[%c0_50, %c0_51] : memref<32x128xf32, #tpu.memory_space<vmem>>, vector<32x128xf32>
    %c0_52 = arith.constant 0 : index
    %c0_53 = arith.constant 0 : index
    %324 = vector.load %arg8[%c0_52, %c0_53] : memref<32x128xf32, #tpu.memory_space<vmem>>, vector<32x128xf32>
    %c0_54 = arith.constant 0 : index
    %c0_55 = arith.constant 0 : index
    %325 = vector.load %arg9[%c0_54, %c0_55] : memref<1x128xf32, #tpu.memory_space<vmem>>, vector<1x128xf32>
    %cst_56 = arith.constant dense<0.000000e+00> : vector<8x128xf32>
    %326 = tpu.matmul %322, %323, %cst_56 {dimension_numbers = #tpu.dot_dimension_numbers<[1], [0], [0], [1], [0, 0, 1, 1], [], []>} : vector<8x32xf32>, vector<32x128xf32>, vector<8x128xf32> -> vector<8x128xf32>
    %327 = vector.broadcast %325 : vector<1x128xf32> to vector<8x128xf32>
    %328 = arith.addf %326, %327 : vector<8x128xf32>
    %cst_57 = arith.constant 0.000000e+00 : f32
    %329 = vector.broadcast %cst_57 : f32 to vector<1x32xf32>
    %cst_58 = arith.constant 0.000000e+00 : f32
    %330 = vector.broadcast %cst_58 : f32 to vector<1x32xf32>
    %331 = vector.extract_strided_slice %328 {offsets = [0, 0], sizes = [1, 128], strides = [1, 1]} : vector<8x128xf32> to vector<1x128xf32>
    %cst_59 = arith.constant dense<0.000000e+00> : vector<1x128xf32>
    %332 = tpu.matmul %329, %324, %cst_59 {dimension_numbers = #tpu.dot_dimension_numbers<[1], [0], [0], [1], [0, 0, 1, 1], [], []>} : vector<1x32xf32>, vector<32x128xf32>, vector<1x128xf32> -> vector<1x128xf32>
    %333 = arith.addf %331, %332 : vector<1x128xf32>
    %334 = vector.extract_strided_slice %333 {offsets = [0, 0], sizes = [1, 96], strides = [1, 1]} : vector<1x128xf32> to vector<1x96xf32>
    %335 = arith.negf %334 : vector<1x96xf32>
    %336 = math.exp %335 : vector<1x96xf32>
    %cst_60 = arith.constant 1.000000e+00 : f32
    %337 = vector.broadcast %cst_60 : f32 to vector<1x96xf32>
    %338 = arith.addf %337, %336 : vector<1x96xf32>
    %339 = arith.divf %337, %338 : vector<1x96xf32>
    %340 = vector.extract_strided_slice %333 {offsets = [0, 96], sizes = [1, 32], strides = [1, 1]} : vector<1x128xf32> to vector<1x32xf32>
    %341 = math.tanh %340 : vector<1x32xf32>
    %342 = vector.extract_strided_slice %339 {offsets = [0, 0], sizes = [1, 32], strides = [1, 1]} : vector<1x96xf32> to vector<1x32xf32>
    %343 = vector.extract_strided_slice %339 {offsets = [0, 32], sizes = [1, 32], strides = [1, 1]} : vector<1x96xf32> to vector<1x32xf32>
    %344 = vector.extract_strided_slice %339 {offsets = [0, 64], sizes = [1, 32], strides = [1, 1]} : vector<1x96xf32> to vector<1x32xf32>
    %345 = arith.mulf %343, %330 : vector<1x32xf32>
    %346 = arith.mulf %342, %341 : vector<1x32xf32>
    %347 = arith.addf %345, %346 : vector<1x32xf32>
    %348 = math.tanh %347 : vector<1x32xf32>
    %349 = arith.mulf %344, %348 : vector<1x32xf32>
    %350 = vector.extract_strided_slice %328 {offsets = [1, 0], sizes = [1, 128], strides = [1, 1]} : vector<8x128xf32> to vector<1x128xf32>
    %cst_61 = arith.constant dense<0.000000e+00> : vector<1x128xf32>
    %351 = tpu.matmul %349, %324, %cst_61 {dimension_numbers = #tpu.dot_dimension_numbers<[1], [0], [0], [1], [0, 0, 1, 1], [], []>} : vector<1x32xf32>, vector<32x128xf32>, vector<1x128xf32> -> vector<1x128xf32>
    %352 = arith.addf %350, %351 : vector<1x128xf32>
    %353 = vector.extract_strided_slice %352 {offsets = [0, 0], sizes = [1, 96], strides = [1, 1]} : vector<1x128xf32> to vector<1x96xf32>
    %354 = arith.negf %353 : vector<1x96xf32>
    %355 = math.exp %354 : vector<1x96xf32>
    %cst_62 = arith.constant 1.000000e+00 : f32
    %356 = vector.broadcast %cst_62 : f32 to vector<1x96xf32>
    %357 = arith.addf %356, %355 : vector<1x96xf32>
    %358 = arith.divf %356, %357 : vector<1x96xf32>
    %359 = vector.extract_strided_slice %352 {offsets = [0, 96], sizes = [1, 32], strides = [1, 1]} : vector<1x128xf32> to vector<1x32xf32>
    %360 = math.tanh %359 : vector<1x32xf32>
    %361 = vector.extract_strided_slice %358 {offsets = [0, 0], sizes = [1, 32], strides = [1, 1]} : vector<1x96xf32> to vector<1x32xf32>
    %362 = vector.extract_strided_slice %358 {offsets = [0, 32], sizes = [1, 32], strides = [1, 1]} : vector<1x96xf32> to vector<1x32xf32>
    %363 = vector.extract_strided_slice %358 {offsets = [0, 64], sizes = [1, 32], strides = [1, 1]} : vector<1x96xf32> to vector<1x32xf32>
    %364 = arith.mulf %362, %347 : vector<1x32xf32>
    %365 = arith.mulf %361, %360 : vector<1x32xf32>
    %366 = arith.addf %364, %365 : vector<1x32xf32>
    %367 = math.tanh %366 : vector<1x32xf32>
    %368 = arith.mulf %363, %367 : vector<1x32xf32>
    %369 = vector.extract_strided_slice %328 {offsets = [2, 0], sizes = [1, 128], strides = [1, 1]} : vector<8x128xf32> to vector<1x128xf32>
    %cst_63 = arith.constant dense<0.000000e+00> : vector<1x128xf32>
    %370 = tpu.matmul %368, %324, %cst_63 {dimension_numbers = #tpu.dot_dimension_numbers<[1], [0], [0], [1], [0, 0, 1, 1], [], []>} : vector<1x32xf32>, vector<32x128xf32>, vector<1x128xf32> -> vector<1x128xf32>
    %371 = arith.addf %369, %370 : vector<1x128xf32>
    %372 = vector.extract_strided_slice %371 {offsets = [0, 0], sizes = [1, 96], strides = [1, 1]} : vector<1x128xf32> to vector<1x96xf32>
    %373 = arith.negf %372 : vector<1x96xf32>
    %374 = math.exp %373 : vector<1x96xf32>
    %cst_64 = arith.constant 1.000000e+00 : f32
    %375 = vector.broadcast %cst_64 : f32 to vector<1x96xf32>
    %376 = arith.addf %375, %374 : vector<1x96xf32>
    %377 = arith.divf %375, %376 : vector<1x96xf32>
    %378 = vector.extract_strided_slice %371 {offsets = [0, 96], sizes = [1, 32], strides = [1, 1]} : vector<1x128xf32> to vector<1x32xf32>
    %379 = math.tanh %378 : vector<1x32xf32>
    %380 = vector.extract_strided_slice %377 {offsets = [0, 0], sizes = [1, 32], strides = [1, 1]} : vector<1x96xf32> to vector<1x32xf32>
    %381 = vector.extract_strided_slice %377 {offsets = [0, 32], sizes = [1, 32], strides = [1, 1]} : vector<1x96xf32> to vector<1x32xf32>
    %382 = vector.extract_strided_slice %377 {offsets = [0, 64], sizes = [1, 32], strides = [1, 1]} : vector<1x96xf32> to vector<1x32xf32>
    %383 = arith.mulf %381, %366 : vector<1x32xf32>
    %384 = arith.mulf %380, %379 : vector<1x32xf32>
    %385 = arith.addf %383, %384 : vector<1x32xf32>
    %386 = math.tanh %385 : vector<1x32xf32>
    %387 = arith.mulf %382, %386 : vector<1x32xf32>
    %388 = vector.extract_strided_slice %328 {offsets = [3, 0], sizes = [1, 128], strides = [1, 1]} : vector<8x128xf32> to vector<1x128xf32>
    %cst_65 = arith.constant dense<0.000000e+00> : vector<1x128xf32>
    %389 = tpu.matmul %387, %324, %cst_65 {dimension_numbers = #tpu.dot_dimension_numbers<[1], [0], [0], [1], [0, 0, 1, 1], [], []>} : vector<1x32xf32>, vector<32x128xf32>, vector<1x128xf32> -> vector<1x128xf32>
    %390 = arith.addf %388, %389 : vector<1x128xf32>
    %391 = vector.extract_strided_slice %390 {offsets = [0, 0], sizes = [1, 96], strides = [1, 1]} : vector<1x128xf32> to vector<1x96xf32>
    %392 = arith.negf %391 : vector<1x96xf32>
    %393 = math.exp %392 : vector<1x96xf32>
    %cst_66 = arith.constant 1.000000e+00 : f32
    %394 = vector.broadcast %cst_66 : f32 to vector<1x96xf32>
    %395 = arith.addf %394, %393 : vector<1x96xf32>
    %396 = arith.divf %394, %395 : vector<1x96xf32>
    %397 = vector.extract_strided_slice %390 {offsets = [0, 96], sizes = [1, 32], strides = [1, 1]} : vector<1x128xf32> to vector<1x32xf32>
    %398 = math.tanh %397 : vector<1x32xf32>
    %399 = vector.extract_strided_slice %396 {offsets = [0, 0], sizes = [1, 32], strides = [1, 1]} : vector<1x96xf32> to vector<1x32xf32>
    %400 = vector.extract_strided_slice %396 {offsets = [0, 32], sizes = [1, 32], strides = [1, 1]} : vector<1x96xf32> to vector<1x32xf32>
    %401 = vector.extract_strided_slice %396 {offsets = [0, 64], sizes = [1, 32], strides = [1, 1]} : vector<1x96xf32> to vector<1x32xf32>
    %402 = arith.mulf %400, %385 : vector<1x32xf32>
    %403 = arith.mulf %399, %398 : vector<1x32xf32>
    %404 = arith.addf %402, %403 : vector<1x32xf32>
    %405 = math.tanh %404 : vector<1x32xf32>
    %406 = arith.mulf %401, %405 : vector<1x32xf32>
    %407 = vector.extract_strided_slice %328 {offsets = [4, 0], sizes = [1, 128], strides = [1, 1]} : vector<8x128xf32> to vector<1x128xf32>
    %cst_67 = arith.constant dense<0.000000e+00> : vector<1x128xf32>
    %408 = tpu.matmul %406, %324, %cst_67 {dimension_numbers = #tpu.dot_dimension_numbers<[1], [0], [0], [1], [0, 0, 1, 1], [], []>} : vector<1x32xf32>, vector<32x128xf32>, vector<1x128xf32> -> vector<1x128xf32>
    %409 = arith.addf %407, %408 : vector<1x128xf32>
    %410 = vector.extract_strided_slice %409 {offsets = [0, 0], sizes = [1, 96], strides = [1, 1]} : vector<1x128xf32> to vector<1x96xf32>
    %411 = arith.negf %410 : vector<1x96xf32>
    %412 = math.exp %411 : vector<1x96xf32>
    %cst_68 = arith.constant 1.000000e+00 : f32
    %413 = vector.broadcast %cst_68 : f32 to vector<1x96xf32>
    %414 = arith.addf %413, %412 : vector<1x96xf32>
    %415 = arith.divf %413, %414 : vector<1x96xf32>
    %416 = vector.extract_strided_slice %409 {offsets = [0, 96], sizes = [1, 32], strides = [1, 1]} : vector<1x128xf32> to vector<1x32xf32>
    %417 = math.tanh %416 : vector<1x32xf32>
    %418 = vector.extract_strided_slice %415 {offsets = [0, 0], sizes = [1, 32], strides = [1, 1]} : vector<1x96xf32> to vector<1x32xf32>
    %419 = vector.extract_strided_slice %415 {offsets = [0, 32], sizes = [1, 32], strides = [1, 1]} : vector<1x96xf32> to vector<1x32xf32>
    %420 = vector.extract_strided_slice %415 {offsets = [0, 64], sizes = [1, 32], strides = [1, 1]} : vector<1x96xf32> to vector<1x32xf32>
    %421 = arith.mulf %419, %404 : vector<1x32xf32>
    %422 = arith.mulf %418, %417 : vector<1x32xf32>
    %423 = arith.addf %421, %422 : vector<1x32xf32>
    %424 = math.tanh %423 : vector<1x32xf32>
    %425 = arith.mulf %420, %424 : vector<1x32xf32>
    %426 = vector.extract_strided_slice %328 {offsets = [5, 0], sizes = [1, 128], strides = [1, 1]} : vector<8x128xf32> to vector<1x128xf32>
    %cst_69 = arith.constant dense<0.000000e+00> : vector<1x128xf32>
    %427 = tpu.matmul %425, %324, %cst_69 {dimension_numbers = #tpu.dot_dimension_numbers<[1], [0], [0], [1], [0, 0, 1, 1], [], []>} : vector<1x32xf32>, vector<32x128xf32>, vector<1x128xf32> -> vector<1x128xf32>
    %428 = arith.addf %426, %427 : vector<1x128xf32>
    %429 = vector.extract_strided_slice %428 {offsets = [0, 0], sizes = [1, 96], strides = [1, 1]} : vector<1x128xf32> to vector<1x96xf32>
    %430 = arith.negf %429 : vector<1x96xf32>
    %431 = math.exp %430 : vector<1x96xf32>
    %cst_70 = arith.constant 1.000000e+00 : f32
    %432 = vector.broadcast %cst_70 : f32 to vector<1x96xf32>
    %433 = arith.addf %432, %431 : vector<1x96xf32>
    %434 = arith.divf %432, %433 : vector<1x96xf32>
    %435 = vector.extract_strided_slice %428 {offsets = [0, 96], sizes = [1, 32], strides = [1, 1]} : vector<1x128xf32> to vector<1x32xf32>
    %436 = math.tanh %435 : vector<1x32xf32>
    %437 = vector.extract_strided_slice %434 {offsets = [0, 0], sizes = [1, 32], strides = [1, 1]} : vector<1x96xf32> to vector<1x32xf32>
    %438 = vector.extract_strided_slice %434 {offsets = [0, 32], sizes = [1, 32], strides = [1, 1]} : vector<1x96xf32> to vector<1x32xf32>
    %439 = vector.extract_strided_slice %434 {offsets = [0, 64], sizes = [1, 32], strides = [1, 1]} : vector<1x96xf32> to vector<1x32xf32>
    %440 = arith.mulf %438, %423 : vector<1x32xf32>
    %441 = arith.mulf %437, %436 : vector<1x32xf32>
    %442 = arith.addf %440, %441 : vector<1x32xf32>
    %443 = math.tanh %442 : vector<1x32xf32>
    %444 = arith.mulf %439, %443 : vector<1x32xf32>
    %445 = vector.extract_strided_slice %328 {offsets = [6, 0], sizes = [1, 128], strides = [1, 1]} : vector<8x128xf32> to vector<1x128xf32>
    %cst_71 = arith.constant dense<0.000000e+00> : vector<1x128xf32>
    %446 = tpu.matmul %444, %324, %cst_71 {dimension_numbers = #tpu.dot_dimension_numbers<[1], [0], [0], [1], [0, 0, 1, 1], [], []>} : vector<1x32xf32>, vector<32x128xf32>, vector<1x128xf32> -> vector<1x128xf32>
    %447 = arith.addf %445, %446 : vector<1x128xf32>
    %448 = vector.extract_strided_slice %447 {offsets = [0, 0], sizes = [1, 96], strides = [1, 1]} : vector<1x128xf32> to vector<1x96xf32>
    %449 = arith.negf %448 : vector<1x96xf32>
    %450 = math.exp %449 : vector<1x96xf32>
    %cst_72 = arith.constant 1.000000e+00 : f32
    %451 = vector.broadcast %cst_72 : f32 to vector<1x96xf32>
    %452 = arith.addf %451, %450 : vector<1x96xf32>
    %453 = arith.divf %451, %452 : vector<1x96xf32>
    %454 = vector.extract_strided_slice %447 {offsets = [0, 96], sizes = [1, 32], strides = [1, 1]} : vector<1x128xf32> to vector<1x32xf32>
    %455 = math.tanh %454 : vector<1x32xf32>
    %456 = vector.extract_strided_slice %453 {offsets = [0, 0], sizes = [1, 32], strides = [1, 1]} : vector<1x96xf32> to vector<1x32xf32>
    %457 = vector.extract_strided_slice %453 {offsets = [0, 32], sizes = [1, 32], strides = [1, 1]} : vector<1x96xf32> to vector<1x32xf32>
    %458 = vector.extract_strided_slice %453 {offsets = [0, 64], sizes = [1, 32], strides = [1, 1]} : vector<1x96xf32> to vector<1x32xf32>
    %459 = arith.mulf %457, %442 : vector<1x32xf32>
    %460 = arith.mulf %456, %455 : vector<1x32xf32>
    %461 = arith.addf %459, %460 : vector<1x32xf32>
    %462 = math.tanh %461 : vector<1x32xf32>
    %463 = arith.mulf %458, %462 : vector<1x32xf32>
    %464 = vector.extract_strided_slice %328 {offsets = [7, 0], sizes = [1, 128], strides = [1, 1]} : vector<8x128xf32> to vector<1x128xf32>
    %cst_73 = arith.constant dense<0.000000e+00> : vector<1x128xf32>
    %465 = tpu.matmul %463, %324, %cst_73 {dimension_numbers = #tpu.dot_dimension_numbers<[1], [0], [0], [1], [0, 0, 1, 1], [], []>} : vector<1x32xf32>, vector<32x128xf32>, vector<1x128xf32> -> vector<1x128xf32>
    %466 = arith.addf %464, %465 : vector<1x128xf32>
    %467 = vector.extract_strided_slice %466 {offsets = [0, 0], sizes = [1, 96], strides = [1, 1]} : vector<1x128xf32> to vector<1x96xf32>
    %468 = arith.negf %467 : vector<1x96xf32>
    %469 = math.exp %468 : vector<1x96xf32>
    %cst_74 = arith.constant 1.000000e+00 : f32
    %470 = vector.broadcast %cst_74 : f32 to vector<1x96xf32>
    %471 = arith.addf %470, %469 : vector<1x96xf32>
    %472 = arith.divf %470, %471 : vector<1x96xf32>
    %473 = vector.extract_strided_slice %466 {offsets = [0, 96], sizes = [1, 32], strides = [1, 1]} : vector<1x128xf32> to vector<1x32xf32>
    %474 = math.tanh %473 : vector<1x32xf32>
    %475 = vector.extract_strided_slice %472 {offsets = [0, 0], sizes = [1, 32], strides = [1, 1]} : vector<1x96xf32> to vector<1x32xf32>
    %476 = vector.extract_strided_slice %472 {offsets = [0, 32], sizes = [1, 32], strides = [1, 1]} : vector<1x96xf32> to vector<1x32xf32>
    %477 = vector.extract_strided_slice %472 {offsets = [0, 64], sizes = [1, 32], strides = [1, 1]} : vector<1x96xf32> to vector<1x32xf32>
    %478 = arith.mulf %476, %461 : vector<1x32xf32>
    %479 = arith.mulf %475, %474 : vector<1x32xf32>
    %480 = arith.addf %478, %479 : vector<1x32xf32>
    %481 = math.tanh %480 : vector<1x32xf32>
    %482 = arith.mulf %477, %481 : vector<1x32xf32>
    %483 = tpu.concatenate %349, %368, %387, %406, %425, %444, %463, %482 in 0 : vector<1x32xf32>, vector<1x32xf32>, vector<1x32xf32>, vector<1x32xf32>, vector<1x32xf32>, vector<1x32xf32>, vector<1x32xf32>, vector<1x32xf32> -> vector<8x32xf32>
    %c0_75 = arith.constant 0 : index
    %c0_76 = arith.constant 0 : index
    %484 = vector.load %arg10[%c0_75, %c0_76] : memref<8x32xf32, #tpu.memory_space<vmem>>, vector<8x32xf32>
    tpu.vector_store %arg10[%c0_75, %c0_76], %483 {strides = array<i32>} : memref<8x32xf32, #tpu.memory_space<vmem>>, vector<8x32xf32>,
    %485 = tpu.concatenate %160, %321, %482 in 0 : vector<1x32xf32>, vector<1x32xf32>, vector<1x32xf32> -> vector<3x32xf32>
    %c0_77 = arith.constant 0 : index
    %c0_78 = arith.constant 0 : index
    %486 = vector.load %arg11[%c0_77, %c0_78] : memref<3x32xf32, #tpu.memory_space<vmem>>, vector<3x32xf32>
    tpu.vector_store %arg11[%c0_77, %c0_78], %485 {strides = array<i32>} : memref<3x32xf32, #tpu.memory_space<vmem>>, vector<3x32xf32>,
    %487 = tpu.concatenate %158, %319, %480 in 0 : vector<1x32xf32>, vector<1x32xf32>, vector<1x32xf32> -> vector<3x32xf32>
    %c0_79 = arith.constant 0 : index
    %c0_80 = arith.constant 0 : index
    %488 = vector.load %arg12[%c0_79, %c0_80] : memref<3x32xf32, #tpu.memory_space<vmem>>, vector<3x32xf32>
    tpu.vector_store %arg12[%c0_79, %c0_80], %487 {strides = array<i32>} : memref<3x32xf32, #tpu.memory_space<vmem>>, vector<3x32xf32>,
    return
  }
}

</mosaic_0001>

<bundles_post_ra>
// kernel: tpu_custom_call.1
= control target key start
LH: loop header
LB: loop body
LE: loop exit
PB: predicated region body
PF: predicated region fallthrough
CT: control target
= control target key end

     0   :  { %18 = vsyncpa [#allocation3], 0  ;;  %s2780_s0 = inlined_call_operand.vmem [shape: f32[8,4], index: 0, kind: input, shape index: {}]   ;;  %s2781_s1 = inlined_call_operand.vmem [shape: f32[4,128], index: 1, kind: input, shape index: {}]   ;;  %s2782_s2 = inlined_call_operand.hbm [shape: f32[32,128], index: 2, kind: input, shape index: {}]   ;;  %s2783_s3 = inlined_call_operand.vmem [shape: f32[1,128], index: 3, kind: input, shape index: {}]   ;;  %s2784_s4 = inlined_call_operand.hbm [shape: f32[32,128], index: 4, kind: input, shape index: {}]   ;;  %s2785_s5 = inlined_call_operand.hbm [shape: f32[32,128], index: 5, kind: input, shape index: {}]   ;;  %s2786_s6 = inlined_call_operand.vmem [shape: f32[1,128], index: 6, kind: input, shape index: {}]   ;;  %s2787_s7 = inlined_call_operand.hbm [shape: f32[32,128], index: 7, kind: input, shape index: {}]   ;;  %s2788_s8 = inlined_call_operand.hbm [shape: f32[32,128], index: 8, kind: input, shape index: {}]   ;;  %s2789_s9 = inlined_call_operand.vmem [shape: f32[1,128], index: 9, kind: input, shape index: {}]   ;;  %s2790_s10 = inlined_call_operand.hbm [shape: f32[8,32], index: 10, kind: output, shape index: {0}]   ;;  %s2791_s11 = inlined_call_operand.hbm [shape: f32[3,32], index: 11, kind: output, shape index: {1}]   ;;  %s2792_s12 = inlined_call_operand.hbm [shape: f32[3,32], index: 12, kind: output, shape index: {2}]  }
   0x1   :  { %19 = vsyncpa [#allocation6], 0 }
   0x2   :  { %20 = vsyncpa [#allocation9], 0 }
   0x3   :  { %21 = vsyncpa [#allocation4], 0 }
   0x4   :  { %22 = vsyncpa [#allocation13], 0  ;;  %s46_s23 = sshll.u32 %s2784_s4, 4  ;;  %s2450_s24 = smov [#allocation5]   ;;  %s47_s23 = int_to_ptr.hbm [resolvable:$true] %s46_s23 }
   0x5   :  { %s48_s25 = sshll.u32 %s2450_s24, 4  ;;  %s74_s28 = sshll.u32 %s2787_s7, 4  ;;  %s49_s25 = int_to_ptr.vmem [resolvable:$true] %s48_s25  ;;  %s75_s28 = int_to_ptr.hbm [resolvable:$true] %s74_s28 }
   0x6   :  { %s2451_s29 = smov 128   ;;  %s2452_s30 = smov 8  }
   0x7   :  { %54 = dma.hbm_to_vmem [thread:$0]  %s47_s23, 512, %s49_s25, [#allocation6], %s2451_s29, %s2451_s29, %s2452_s30  }
   0x8   :  { %s2453_s13 = smov [#allocation8]   ;;  %s31_s17 = sshll.u32 %s2782_s2, 4  ;;  %s32_s17 = int_to_ptr.hbm [resolvable:$true] %s31_s17 }
   0x9   :  { %s76_s14 = sshll.u32 %s2453_s13, 4  ;;  %s59_s19 = sshll.u32 %s2785_s5, 4  ;;  %s77_s14 = int_to_ptr.vmem [resolvable:$true] %s76_s14  ;;  %s60_s19 = int_to_ptr.hbm [resolvable:$true] %s59_s19 }
   0xa   :  { %82 = dma.hbm_to_vmem [thread:$0]  %s75_s28, 512, %s77_s14, [#allocation9], %s2451_s29, %s2451_s29, %s2452_s30  }
   0xb   :  { %s2454_s20 = smov [#allocation2]   ;;  %s2455_s7 = smov [#allocation7]  }
   0xc   :  { %s33_s21 = sshll.u32 %s2454_s20, 4  ;;  %s61_s22 = sshll.u32 %s2455_s7, 4  ;;  %s34_s21 = int_to_ptr.vmem [resolvable:$true] %s33_s21  ;;  %s62_s22 = int_to_ptr.vmem [resolvable:$true] %s61_s22 }
   0xd   :  { %39 = dma.hbm_to_vmem [thread:$0]  %s32_s17, 512, %s34_s21, [#allocation3], %s2451_s29, %s2451_s29, %s2452_s30  }
   0xe   :  { %s87_s25 = sshll.u32 %s2788_s8, 4  ;;  %s2456_s2 = smov [#allocation10]   ;;  %s88_s25 = int_to_ptr.hbm [resolvable:$true] %s87_s25 }
   0xf   :  { %67 = dma.hbm_to_vmem [thread:$0]  %s60_s19, 512, %s62_s22, [#allocation6], %s2451_s29, %s2451_s29, %s2452_s30  }
  0x10   :  { %s89_s26 = sshll.u32 %s2456_s2, 4  ;;  %s90_s26 = int_to_ptr.vmem [resolvable:$true] %s89_s26 }
  0x11   :  { %95 = dma.hbm_to_vmem [thread:$0]  %s88_s25, 512, %s90_s26, [#allocation9], %s2451_s29, %s2451_s29, %s2452_s30  }
  0x12   :  { %2440 = dma.done.wait [#allocation3], 512  }
  0x13   :  { %2441 = vsyncadd [#allocation3], 4294966784 }
  0x14   :  { %2442 = dma.done.wait [#allocation6], 1024  }
  0x15   :  { %2443 = vsyncadd [#allocation6], 4294966272 }
  0x16   :  { %2444 = dma.done.wait [#allocation9], 1024  }
  0x17   :  { %2445 = vsyncadd [#allocation9], 4294966272  ;;  %vm132_vm0 = vcmask 1043456   ;;  %vm128_vm1 = vcmask 31744   ;;  %v123_v0 = vld [vmem:[#allocation2 + $0x18] sm:$0xff]  ;;  %v122_v1 = vld [vmem:[#allocation2 + $0x10] sm:$0xff] }
  0x18   :  { %v119_v2 = vld [vmem:[%s2781_s1] sm:$0xf]  ;;  %172 = vmatpush.msra.mxu1 %v123_v0  ;;  %v121_v4 = vld [vmem:[#allocation2 + $0x8] sm:$0xff]  ;;  %235 = vmatpush.msra.mxu2 %v123_v0  ;;  %v2457_v6 = vmov 0.0   ;;  %s2458_s29 = smov 32   ;;  %vm156_vm6 = vcmask 261120  }
  0x19   :  { %1990 = vmatpush.msk.msra.mxu0 %vm132_vm0, %v119_v2  ;;  %v118_v3 = vld [vmem:[%s2780_s0] sm:$0xff]  ;;  %305 = vmatpush.msra.mxu3 %v123_v0  ;;  %vm707_vm15 = vcmask 1040384   ;;  %s2461_s15 = smov [#allocation12]   ;;  %s1958_s18 = sshll.u32 %s2791_s11, 4  ;;  %s1959_s18 = int_to_ptr.hbm [resolvable:$true] %s1958_s18 }
  0x1a   :  { %1991 = vmatmul.msk.f32.vlgmr.msra.gmra.mxu0 %vm128_vm1, %v118_v3  ;;  %173 = vmatpush.msra.mxu1 %v122_v1  ;;  %v120_v5 = vld [vmem:[#allocation2] sm:$0xff]  ;;  %vm709_vm1 = vcmask 1041408   ;;  %s1956_s16 = sshll.u32 %s2461_s15, 4  ;;  %s2462_s19 = smov [#allocation14]   ;;  %s1957_s16 = int_to_ptr.vmem [resolvable:$true] %s1956_s16 }
  0x1b   :  { %236 = vmatpush.msra.mxu2 %v122_v1  ;;  %375 = vmatpush.msrb.mxu0 %v123_v0  ;;  %v2053_v7 = vld [vmem:[%s2783_s3] ss:$0 sm:$0xff]  ;;  %s2459_s3 = smov 64   ;;  %s1967_s20 = sshll.u32 %s2462_s19, 4  ;;  %s1968_s20 = int_to_ptr.vmem [resolvable:$true] %s1967_s20 }
  0x1c   :  { %174 = vmatpush.msra.mxu1 %v121_v4  ;;  %306 = vmatpush.msra.mxu3 %v122_v1  ;;  %s1969_s22 = sshll.u32 %s2792_s12, 4  ;;  %s2463_s23 = smov [#allocation11]   ;;  %s1970_s22 = int_to_ptr.hbm [resolvable:$true] %s1969_s22 }
  0x1d   :  { %237 = vmatpush.msra.mxu2 %v121_v4  ;;  %376 = vmatpush.msrb.mxu0 %v122_v1  ;;  %s1945_s24 = sshll.u32 %s2463_s23, 4  ;;  %s1947_s11 = sshll.u32 %s2790_s10, 4  ;;  %s1946_s24 = int_to_ptr.vmem [resolvable:$true] %s1945_s24  ;;  %s1948_s11 = int_to_ptr.hbm [resolvable:$true] %s1947_s11 }
  0x1e   :  { %175 = vmatpush.msra.mxu1 %v120_v5  ;;  %307 = vmatpush.msra.mxu3 %v121_v4 }
  0x1f   :  { %176 = vmatmul.f32.vlgmr.msra.gmra.mxu1 %v2457_v6  ;;  %238 = vmatpush.msra.mxu2 %v120_v5 }
  0x20   :  { %308 = vmatpush.msra.mxu3 %v120_v5  ;;  %377 = vmatpush.msrb.mxu0 %v121_v4 }
  0x21   :  { %445 = vmatpush.msrb.mxu1 %v123_v0  ;;  %515 = vmatpush.msrb.mxu2 %v123_v0 }
  0x22   :  { %378 = vmatpush.msrb.mxu0 %v120_v5  ;;  %585 = vmatpush.msrb.mxu3 %v123_v0 }
  0x23   :  { %446 = vmatpush.msrb.mxu1 %v122_v1  ;;  %516 = vmatpush.msrb.mxu2 %v122_v1 }
  0x24   :  { %586 = vmatpush.msrb.mxu3 %v122_v1  ;;  %655 = vmatpush.msra.mxu0 %v123_v0 }
  0x25   :  { %447 = vmatpush.msrb.mxu1 %v121_v4  ;;  %517 = vmatpush.msrb.mxu2 %v121_v4 }
  0x26   :  { %587 = vmatpush.msrb.mxu3 %v121_v4  ;;  %656 = vmatpush.msra.mxu0 %v122_v1 }
  0x27   :  { %448 = vmatpush.msrb.mxu1 %v120_v5  ;;  %518 = vmatpush.msrb.mxu2 %v120_v5 }
  0x28   :  { %588 = vmatpush.msrb.mxu3 %v120_v5  ;;  %657 = vmatpush.msra.mxu0 %v121_v4 }
  0x2a   :  { %658 = vmatpush.msra.mxu0 %v120_v5 }
  0x97   :  { %v153_v8 = vpop.f32.mrf.mxu0 }
  0x98   :  { %v2555_v9 = vadd.f32 %v2053_v7, %v153_v8 }
  0x9c   :  { %v177_v10 = vpop.f32.mrf.mxu1 }
  0x9d   :  { %v180_v11 = vadd.f32 %v177_v10, %v2555_v9 }
  0x9f   :  { %2056 = vtanh.f32 %v180_v11  ;;  %v1992_v13 = vmul.f32 -1.442695, %v180_v11 }
  0xa1   :  { %2058 = vpow2.f32 %v1992_v13 }
  0xa5   :  { %v2057_v12 = vpop.eup %2056 }
  0xa6   :  { %203 = vrot.lane.b32.xlu0 %v2057_v12, %s2458_s29 }
  0xa7   :  { %v2059_v14 = vpop.eup %2058 }
  0xa8   :  { %v184_v15 = vadd.f32 1.0, %v2059_v14 }
  0xaa   :  { %2060 = vrcp.f32 %v184_v15  ;;  %v196_v21 = vand.u32 2147483648, %v184_v15  ;;  %vm190_vm3 = vweird.f32 %v184_v15  ;;  %v194_v22 = vand.u32 2147483647, %v184_v15 }
  0xac   :  { %v197_v24 = vor.u32 1.1754944e-38, %v196_v21  ;;  %vm195_vm5 = vcmp.eq.f32.partialorder %v194_v22, 8.507059e+37 }
  0xb0   :  { %v2061_v16 = vpop.eup %2060 }
  0xb1   :  { %v186_v17 = vmul.f32 %v2061_v16, %v184_v15  ;;  %vm191_vm2 = vweird.f32 %v2061_v16 }
  0xb2   :  { %vm192_vm4 = vmor %vm190_vm3, %vm191_vm2 }
  0xb3   :  { %v187_v18 = vsub.f32 1.0, %v186_v17 }
  0xb5   :  { %v188_v19 = vmul.f32 %v2061_v16, %v187_v18 }
  0xb7   :  { %v189_v20 = vadd.f32 %v2061_v16, %v188_v19 }
  0xb9   :  { %v193_v23 = vsel %vm192_vm4, %v2061_v16, %v189_v20 }
  0xba   :  { %v198_v26 = vsel %vm195_vm5, %v197_v24, %v193_v23 }
  0xbb   :  { %v201_v28 = vmul.f32 0.0, %v198_v26 }
 0x118   :  { %v204_v25 = vpop.permute.xlu0 %203 }
 0x119   :  { %v206_v27 = vmul.f32 %v204_v25, %v198_v26 }
 0x11b   :  { %208 = vrot.lane.b32.xlu0 %v206_v27, %s2458_s29 }
 0x18d   :  { %v209_v29 = vpop.permute.xlu0 %208 }
 0x18e   :  { %v211_v30 = vadd.f32 %v209_v29, %v201_v28 }
 0x190   :  { %2062 = vtanh.f32 %v211_v30  ;;  %v268_v54 = vrot.slane %v211_v30, 7 }
 0x196   :  { %v2063_v31 = vpop.eup %2062 }
 0x197   :  { %214 = vrot.lane.b32.xlu1 %v2063_v31, %s2458_s29 }
 0x209   :  { %v215_v32 = vpop.permute.xlu1 %214 }
 0x20a   :  { %v2561_v33 = vmul.f32 %v215_v32, %v198_v26 }
 0x20c   :  { %219 = vrot.lane.b32.xlu1 %v2561_v33, %s2459_s3 }
 0x27e   :  { %v220_v34 = vpop.permute.xlu1 %219 }
 0x27f   :  { %1993 = vmatmul.msk.f32.vlgmr.msra.gmra.mxu2 %vm156_vm6, %v220_v34 }
 0x302   :  { %v240_v35 = vpop.f32.mrf.mxu2 }
 0x303   :  { %v244_v36 = vrot.slane %v240_v35, 7 }
 0x305   :  { %v246_v37 = vadd.f32 %v244_v36, %v2555_v9 }
 0x307   :  { %2064 = vtanh.f32 %v246_v37  ;;  %v1994_v39 = vmul.f32 -1.442695, %v246_v37 }
 0x309   :  { %2066 = vpow2.f32 %v1994_v39 }
 0x30d   :  { %v2065_v38 = vpop.eup %2064 }
 0x30e   :  { %272 = vrot.lane.b32.xlu2 %v2065_v38, %s2458_s29 }
 0x30f   :  { %v2067_v40 = vpop.eup %2066 }
 0x310   :  { %v250_v41 = vadd.f32 1.0, %v2067_v40 }
 0x312   :  { %2068 = vrcp.f32 %v250_v41  ;;  %v262_v47 = vand.u32 2147483648, %v250_v41  ;;  %vm256_vm8 = vweird.f32 %v250_v41  ;;  %v260_v48 = vand.u32 2147483647, %v250_v41 }
 0x314   :  { %v263_v50 = vor.u32 1.1754944e-38, %v262_v47  ;;  %vm261_vm10 = vcmp.eq.f32.partialorder %v260_v48, 8.507059e+37 }
 0x318   :  { %v2069_v42 = vpop.eup %2068 }
 0x319   :  { %v252_v43 = vmul.f32 %v2069_v42, %v250_v41  ;;  %vm257_vm7 = vweird.f32 %v2069_v42 }
 0x31a   :  { %vm258_vm9 = vmor %vm256_vm8, %vm257_vm7  ;;  %vm711_vm7 = vcmask 1042432  }
 0x31b   :  { %v253_v44 = vsub.f32 1.0, %v252_v43 }
 0x31d   :  { %v254_v45 = vmul.f32 %v2069_v42, %v253_v44 }
 0x31f   :  { %v255_v46 = vadd.f32 %v2069_v42, %v254_v45 }
 0x321   :  { %v259_v49 = vsel %vm258_vm9, %v2069_v42, %v255_v46 }
 0x322   :  { %v264_v52 = vsel %vm261_vm10, %v263_v50, %v259_v49 }
 0x323   :  { %v270_v55 = vmul.f32 %v268_v54, %v264_v52 }
 0x368   :  { %v273_v51 = vpop.permute.xlu2 %272 }
 0x369   :  { %v275_v53 = vmul.f32 %v273_v51, %v264_v52 }
 0x36b   :  { %277 = vrot.lane.b32.xlu2 %v275_v53, %s2458_s29 }
 0x3c5   :  { %v278_v56 = vpop.permute.xlu2 %277 }
 0x3c6   :  { %v280_v57 = vadd.f32 %v278_v56, %v270_v55 }
 0x3c8   :  { %2070 = vtanh.f32 %v280_v57  ;;  %v338_v20 = vrot.slane %v280_v57, 7 }
 0x3ce   :  { %v2071_v58 = vpop.eup %2070 }
 0x3cf   :  { %283 = vrot.lane.b32.xlu0 %v2071_v58, %s2458_s29 }
 0x441   :  { %v284_v59 = vpop.permute.xlu0 %283 }
 0x442   :  { %v286_v60 = vmul.f32 %v284_v59, %v264_v52 }
 0x444   :  { %v288_v61 = vrot.slane %v286_v60, 1  ;;  %v708_v27 = vsel %vm707_vm15, %v2561_v33, %v286_v60 }
 0x446   :  { %289 = vrot.lane.b32.xlu1 %v288_v61, %s2459_s3 }
 0x4b8   :  { %v290_v62 = vpop.permute.xlu1 %289 }
 0x4b9   :  { %1995 = vmatmul.msk.f32.vlgmr.msra.gmra.mxu3 %vm156_vm6, %v290_v62 }
 0x53c   :  { %v310_v63 = vpop.f32.mrf.mxu3 }
 0x53d   :  { %v314_v0 = vrot.slane %v310_v63, 6 }
 0x53f   :  { %v316_v1 = vadd.f32 %v314_v0, %v2555_v9 }
 0x541   :  { %2072 = vtanh.f32 %v316_v1  ;;  %v1996_v3 = vmul.f32 -1.442695, %v316_v1 }
 0x543   :  { %2074 = vpow2.f32 %v1996_v3 }
 0x547   :  { %v2073_v2 = vpop.eup %2072 }
 0x548   :  { %342 = vrot.lane.b32.xlu2 %v2073_v2, %s2458_s29 }
 0x549   :  { %v2075_v4 = vpop.eup %2074 }
 0x54a   :  { %v320_v5 = vadd.f32 1.0, %v2075_v4 }
 0x54c   :  { %2076 = vrcp.f32 %v320_v5  ;;  %v332_v13 = vand.u32 2147483648, %v320_v5  ;;  %vm326_vm12 = vweird.f32 %v320_v5  ;;  %v330_v14 = vand.u32 2147483647, %v320_v5 }
 0x54e   :  { %v333_v16 = vor.u32 1.1754944e-38, %v332_v13  ;;  %vm331_vm14 = vcmp.eq.f32.partialorder %v330_v14, 8.507059e+37 }
 0x552   :  { %v2077_v7 = vpop.eup %2076 }
 0x553   :  { %v322_v8 = vmul.f32 %v2077_v7, %v320_v5  ;;  %vm327_vm11 = vweird.f32 %v2077_v7 }
 0x554   :  { %vm328_vm13 = vmor %vm326_vm12, %vm327_vm11 }
 0x555   :  { %v323_v10 = vsub.f32 1.0, %v322_v8 }
 0x557   :  { %v324_v11 = vmul.f32 %v2077_v7, %v323_v10 }
 0x559   :  { %v325_v12 = vadd.f32 %v2077_v7, %v324_v11 }
 0x55b   :  { %v329_v15 = vsel %vm328_vm13, %v2077_v7, %v325_v12 }
 0x55c   :  { %v334_v18 = vsel %vm331_vm14, %v333_v16, %v329_v15 }
 0x55d   :  { %v340_v21 = vmul.f32 %v338_v20, %v334_v18 }
 0x5a2   :  { %v343_v17 = vpop.permute.xlu2 %342 }
 0x5a3   :  { %v345_v19 = vmul.f32 %v343_v17, %v334_v18 }
 0x5a5   :  { %347 = vrot.lane.b32.xlu0 %v345_v19, %s2458_s29 }
 0x617   :  { %v348_v22 = vpop.permute.xlu0 %347 }
 0x618   :  { %v350_v23 = vadd.f32 %v348_v22, %v340_v21 }
 0x61a   :  { %2078 = vtanh.f32 %v350_v23  ;;  %v408_v50 = vrot.slane %v350_v23, 7 }
 0x620   :  { %v2079_v24 = vpop.eup %2078 }
 0x621   :  { %353 = vrot.lane.b32.xlu1 %v2079_v24, %s2458_s29 }
 0x693   :  { %v354_v25 = vpop.permute.xlu1 %353 }
 0x694   :  { %v356_v26 = vmul.f32 %v354_v25, %v334_v18 }
 0x696   :  { %v358_v28 = vrot.slane %v356_v26, 2  ;;  %v710_v29 = vsel %vm709_vm1, %v708_v27, %v356_v26 }
 0x698   :  { %359 = vrot.lane.b32.xlu2 %v358_v28, %s2459_s3 }
 0x6f2   :  { %v360_v30 = vpop.permute.xlu2 %359 }
 0x6f3   :  { %1997 = vmatmul.msk.f32.vlgmr.msrb.gmra.mxu0 %vm156_vm6, %v360_v30 }
 0x770   :  { %v380_v31 = vpop.f32.mrf.mxu0 }
 0x771   :  { %v384_v32 = vrot.slane %v380_v31, 5 }
 0x773   :  { %v386_v34 = vadd.f32 %v384_v32, %v2555_v9 }
 0x775   :  { %2080 = vtanh.f32 %v386_v34  ;;  %v1998_v36 = vmul.f32 -1.442695, %v386_v34 }
 0x777   :  { %2082 = vpow2.f32 %v1998_v36 }
 0x77b   :  { %v2081_v35 = vpop.eup %2080 }
 0x77c   :  { %412 = vrot.lane.b32.xlu0 %v2081_v35, %s2458_s29 }
 0x77d   :  { %v2083_v37 = vpop.eup %2082 }
 0x77e   :  { %v390_v33 = vadd.f32 1.0, %v2083_v37 }
 0x780   :  { %2084 = vrcp.f32 %v390_v33  ;;  %v402_v43 = vand.u32 2147483648, %v390_v33  ;;  %vm396_vm3 = vweird.f32 %v390_v33  ;;  %v400_v44 = vand.u32 2147483647, %v390_v33 }
 0x782   :  { %v403_v46 = vor.u32 1.1754944e-38, %v402_v43  ;;  %vm401_vm5 = vcmp.eq.f32.partialorder %v400_v44, 8.507059e+37 }
 0x786   :  { %v2085_v38 = vpop.eup %2084 }
 0x787   :  { %v392_v39 = vmul.f32 %v2085_v38, %v390_v33  ;;  %vm397_vm2 = vweird.f32 %v2085_v38 }
 0x788   :  { %vm398_vm4 = vmor %vm396_vm3, %vm397_vm2  ;;  %vm714_vm3 = vcmask 1044480  }
 0x789   :  { %v393_v40 = vsub.f32 1.0, %v392_v39 }
 0x78b   :  { %v394_v41 = vmul.f32 %v2085_v38, %v393_v40 }
 0x78d   :  { %v395_v42 = vadd.f32 %v2085_v38, %v394_v41 }
 0x78f   :  { %v399_v45 = vsel %vm398_vm4, %v2085_v38, %v395_v42 }
 0x790   :  { %v404_v48 = vsel %vm401_vm5, %v403_v46, %v399_v45 }
 0x791   :  { %v410_v51 = vmul.f32 %v408_v50, %v404_v48 }
 0x7ee   :  { %v413_v47 = vpop.permute.xlu0 %412 }
 0x7ef   :  { %v415_v49 = vmul.f32 %v413_v47, %v404_v48 }
 0x7f1   :  { %417 = vrot.lane.b32.xlu1 %v415_v49, %s2458_s29 }
 0x863   :  { %v418_v52 = vpop.permute.xlu1 %417 }
 0x864   :  { %v420_v53 = vadd.f32 %v418_v52, %v410_v51 }
 0x866   :  { %2086 = vtanh.f32 %v420_v53  ;;  %v478_v17 = vrot.slane %v420_v53, 7 }
 0x86c   :  { %v2087_v54 = vpop.eup %2086 }
 0x86d   :  { %423 = vrot.lane.b32.xlu2 %v2087_v54, %s2458_s29 }
 0x8c7   :  { %v424_v55 = vpop.permute.xlu2 %423 }
 0x8c8   :  { %v426_v56 = vmul.f32 %v424_v55, %v404_v48 }
 0x8ca   :  { %v428_v57 = vrot.slane %v426_v56, 3  ;;  %v712_v58 = vsel %vm711_vm7, %v710_v29, %v426_v56 }
 0x8cc   :  { %429 = vrot.lane.b32.xlu0 %v428_v57, %s2459_s3 }
 0x93e   :  { %v430_v59 = vpop.permute.xlu0 %429 }
 0x93f   :  { %1999 = vmatmul.msk.f32.vlgmr.msrb.gmra.mxu1 %vm156_vm6, %v430_v59 }
 0x9bc   :  { %v450_v60 = vpop.f32.mrf.mxu1 }
 0x9bd   :  { %v454_v61 = vrot.slane %v450_v60, 4 }
 0x9bf   :  { %v456_v62 = vadd.f32 %v454_v61, %v2555_v9 }
 0x9c1   :  { %2088 = vtanh.f32 %v456_v62  ;;  %v2000_v0 = vmul.f32 -1.442695, %v456_v62 }
 0x9c3   :  { %2090 = vpow2.f32 %v2000_v0 }
 0x9c7   :  { %v2089_v63 = vpop.eup %2088 }
 0x9c8   :  { %482 = vrot.lane.b32.xlu1 %v2089_v63, %s2458_s29 }
 0x9c9   :  { %v2091_v1 = vpop.eup %2090 }
 0x9ca   :  { %v460_v2 = vadd.f32 1.0, %v2091_v1 }
 0x9cc   :  { %2092 = vrcp.f32 %v460_v2  ;;  %v472_v10 = vand.u32 2147483648, %v460_v2  ;;  %vm466_vm9 = vweird.f32 %v460_v2  ;;  %v470_v11 = vand.u32 2147483647, %v460_v2 }
 0x9ce   :  { %v473_v13 = vor.u32 1.1754944e-38, %v472_v10  ;;  %vm471_vm11 = vcmp.eq.f32.partialorder %v470_v11, 8.507059e+37 }
 0x9d2   :  { %v2093_v3 = vpop.eup %2092 }
 0x9d3   :  { %v462_v4 = vmul.f32 %v2093_v3, %v460_v2  ;;  %vm467_vm8 = vweird.f32 %v2093_v3 }
 0x9d4   :  { %vm468_vm10 = vmor %vm466_vm9, %vm467_vm8 }
 0x9d5   :  { %v463_v5 = vsub.f32 1.0, %v462_v4 }
 0x9d7   :  { %v464_v7 = vmul.f32 %v2093_v3, %v463_v5 }
 0x9d9   :  { %v465_v8 = vadd.f32 %v2093_v3, %v464_v7 }
 0x9db   :  { %v469_v12 = vsel %vm468_vm10, %v2093_v3, %v465_v8  ;;  %vm716_vm10 = vcmask 1045504  }
 0x9dc   :  { %v474_v15 = vsel %vm471_vm11, %v473_v13, %v469_v12 }
 0x9dd   :  { %v480_v18 = vmul.f32 %v478_v17, %v474_v15 }
 0xa3a   :  { %v483_v14 = vpop.permute.xlu1 %482 }
 0xa3b   :  { %v485_v16 = vmul.f32 %v483_v14, %v474_v15 }
 0xa3d   :  { %487 = vrot.lane.b32.xlu2 %v485_v16, %s2458_s29 }
 0xa97   :  { %v488_v19 = vpop.permute.xlu2 %487 }
 0xa98   :  { %v490_v20 = vadd.f32 %v488_v19, %v480_v18 }
 0xa9a   :  { %2094 = vtanh.f32 %v490_v20  ;;  %v548_v46 = vrot.slane %v490_v20, 7 }
 0xaa0   :  { %v2095_v21 = vpop.eup %2094 }
 0xaa1   :  { %493 = vrot.lane.b32.xlu0 %v2095_v21, %s2458_s29 }
 0xb13   :  { %v494_v22 = vpop.permute.xlu0 %493 }
 0xb14   :  { %v496_v23 = vmul.f32 %v494_v22, %v474_v15 }
 0xb16   :  { %v498_v24 = vrot.slane %v496_v23, 4  ;;  %v713_v25 = vsel %vm132_vm0, %v712_v58, %v496_v23 }
 0xb18   :  { %499 = vrot.lane.b32.xlu1 %v498_v24, %s2459_s3 }
 0xb8a   :  { %v500_v26 = vpop.permute.xlu1 %499 }
 0xb8b   :  { %2001 = vmatmul.msk.f32.vlgmr.msrb.gmra.mxu2 %vm156_vm6, %v500_v26 }
 0xc0e   :  { %v520_v27 = vpop.f32.mrf.mxu2 }
 0xc0f   :  { %v524_v28 = vrot.slane %v520_v27, 3 }
 0xc11   :  { %v526_v29 = vadd.f32 %v524_v28, %v2555_v9 }
 0xc13   :  { %2096 = vtanh.f32 %v526_v29  ;;  %v2002_v31 = vmul.f32 -1.442695, %v526_v29 }
 0xc15   :  { %2098 = vpow2.f32 %v2002_v31 }
 0xc19   :  { %v2097_v30 = vpop.eup %2096 }
 0xc1a   :  { %552 = vrot.lane.b32.xlu2 %v2097_v30, %s2458_s29 }
 0xc1b   :  { %v2099_v32 = vpop.eup %2098 }
 0xc1c   :  { %v530_v34 = vadd.f32 1.0, %v2099_v32 }
 0xc1e   :  { %2100 = vrcp.f32 %v530_v34  ;;  %v542_v39 = vand.u32 2147483648, %v530_v34  ;;  %vm536_vm13 = vweird.f32 %v530_v34  ;;  %v540_v40 = vand.u32 2147483647, %v530_v34 }
 0xc20   :  { %v543_v42 = vor.u32 1.1754944e-38, %v542_v39  ;;  %vm541_vm2 = vcmp.eq.f32.partialorder %v540_v40, 8.507059e+37 }
 0xc24   :  { %v2101_v35 = vpop.eup %2100 }
 0xc25   :  { %v532_v36 = vmul.f32 %v2101_v35, %v530_v34  ;;  %vm537_vm12 = vweird.f32 %v2101_v35 }
 0xc26   :  { %vm538_vm14 = vmor %vm536_vm13, %vm537_vm12 }
 0xc27   :  { %v533_v37 = vsub.f32 1.0, %v532_v36 }
 0xc29   :  { %v534_v33 = vmul.f32 %v2101_v35, %v533_v37 }
 0xc2b   :  { %v535_v38 = vadd.f32 %v2101_v35, %v534_v33 }
 0xc2d   :  { %v539_v41 = vsel %vm538_vm14, %v2101_v35, %v535_v38 }
 0xc2e   :  { %v544_v44 = vsel %vm541_vm2, %v543_v42, %v539_v41  ;;  %vm718_vm2 = vcmask 1046528  }
 0xc2f   :  { %v550_v47 = vmul.f32 %v548_v46, %v544_v44  ;;  %v727_v46 = vld [vmem:[#allocation7 + $0x18] sm:$0xff] }
 0xc30   :  { %769 = vmatpush.msra.mxu2 %v727_v46  ;;  %832 = vmatpush.msra.mxu3 %v727_v46 }
 0xc31   :  { %902 = vmatpush.msrb.mxu0 %v727_v46 }
 0xc74   :  { %v553_v43 = vpop.permute.xlu2 %552 }
 0xc75   :  { %v555_v45 = vmul.f32 %v553_v43, %v544_v44 }
 0xc77   :  { %557 = vrot.lane.b32.xlu0 %v555_v45, %s2458_s29 }
 0xce9   :  { %v558_v48 = vpop.permute.xlu0 %557 }
 0xcea   :  { %v560_v49 = vadd.f32 %v558_v48, %v550_v47  ;;  %v726_v47 = vld [vmem:[#allocation7 + $0x10] sm:$0xff]  ;;  %v723_v48 = vld [vmem:[#allocation5 + $0x18] sm:$0xff] }
 0xceb   :  { %749 = vmatpush.msra.mxu1 %v723_v48  ;;  %770 = vmatpush.msra.mxu2 %v726_v47 }
 0xcec   :  { %2102 = vtanh.f32 %v560_v49  ;;  %v618_v13 = vrot.slane %v560_v49, 7  ;;  %v722_v49 = vld [vmem:[#allocation5 + $0x10] sm:$0xff]  ;;  %833 = vmatpush.msra.mxu3 %v726_v47  ;;  %903 = vmatpush.msrb.mxu0 %v726_v47 }
 0xced   :  { %750 = vmatpush.msra.mxu1 %v722_v49 }
 0xcf2   :  { %v2103_v50 = vpop.eup %2102 }
 0xcf3   :  { %563 = vrot.lane.b32.xlu1 %v2103_v50, %s2458_s29  ;;  %v725_v50 = vld [vmem:[#allocation7 + $0x8] sm:$0xff] }
 0xcf4   :  { %771 = vmatpush.msra.mxu2 %v725_v50  ;;  %834 = vmatpush.msra.mxu3 %v725_v50 }
 0xcf5   :  { %904 = vmatpush.msrb.mxu0 %v725_v50 }
 0xd65   :  { %v564_v51 = vpop.permute.xlu1 %563 }
 0xd66   :  { %v566_v52 = vmul.f32 %v564_v51, %v544_v44  ;;  %v721_v51 = vld [vmem:[#allocation5 + $0x8] sm:$0xff] }
 0xd67   :  { %751 = vmatpush.msra.mxu1 %v721_v51 }
 0xd68   :  { %v568_v53 = vrot.slane %v566_v52, 5  ;;  %v715_v54 = vsel %vm714_vm3, %v713_v25, %v566_v52  ;;  %v724_v52 = vld [vmem:[#allocation7] sm:$0xff] }
 0xd69   :  { %772 = vmatpush.msra.mxu2 %v724_v52  ;;  %835 = vmatpush.msra.mxu3 %v724_v52 }
 0xd6a   :  { %569 = vrot.lane.b32.xlu2 %v568_v53, %s2459_s3  ;;  %v720_v53 = vld [vmem:[#allocation5] sm:$0xff]  ;;  %773 = vmatmul.f32.vlgmr.msra.gmra.mxu2 %v2457_v6 }
 0xd6b   :  { %752 = vmatpush.msra.mxu1 %v720_v53  ;;  %905 = vmatpush.msrb.mxu0 %v724_v52 }
 0xd6c   :  { %1042 = vmatpush.msrb.mxu2 %v727_v46 }
 0xd6d   :  { %972 = vmatpush.msrb.mxu1 %v727_v46 }
 0xd6e   :  { %1043 = vmatpush.msrb.mxu2 %v726_v47 }
 0xd6f   :  { %973 = vmatpush.msrb.mxu1 %v726_v47 }
 0xd70   :  { %1044 = vmatpush.msrb.mxu2 %v725_v50 }
 0xd71   :  { %974 = vmatpush.msrb.mxu1 %v725_v50 }
 0xd72   :  { %1045 = vmatpush.msrb.mxu2 %v724_v52 }
 0xd73   :  { %975 = vmatpush.msrb.mxu1 %v724_v52 }
 0xdc4   :  { %v570_v55 = vpop.permute.xlu2 %569 }
 0xdc5   :  { %2003 = vmatmul.msk.f32.vlgmr.msrb.gmra.mxu3 %vm156_vm6, %v570_v55 }
 0xdc6   :  { %1112 = vmatpush.msrb.mxu3 %v727_v46 }
 0xdc8   :  { %1113 = vmatpush.msrb.mxu3 %v726_v47 }
 0xdca   :  { %1114 = vmatpush.msrb.mxu3 %v725_v50 }
 0xdcc   :  { %1115 = vmatpush.msrb.mxu3 %v724_v52 }
 0xe48   :  { %v590_v56 = vpop.f32.mrf.mxu3 }
 0xe49   :  { %v594_v57 = vrot.slane %v590_v56, 2 }
 0xe4b   :  { %v596_v58 = vadd.f32 %v594_v57, %v2555_v9 }
 0xe4d   :  { %2104 = vtanh.f32 %v596_v58  ;;  %v2004_v60 = vmul.f32 -1.442695, %v596_v58  ;;  %v2054_v58 = vld [vmem:[%s2786_s6] ss:$0 sm:$0xff] }
 0xe4f   :  { %2106 = vpow2.f32 %v2004_v60  ;;  %v774_v60 = vpop.f32.mrf.mxu2 }
 0xe53   :  { %v2105_v59 = vpop.eup %2104 }
 0xe54   :  { %622 = vrot.lane.b32.xlu0 %v2105_v59, %s2458_s29 }
 0xe55   :  { %v2107_v61 = vpop.eup %2106 }
 0xe56   :  { %v600_v62 = vadd.f32 1.0, %v2107_v61 }
 0xe58   :  { %2108 = vrcp.f32 %v600_v62  ;;  %v612_v4 = vand.u32 2147483648, %v600_v62  ;;  %vm606_vm5 = vweird.f32 %v600_v62  ;;  %v610_v5 = vand.u32 2147483647, %v600_v62 }
 0xe5a   :  { %v613_v8 = vor.u32 1.1754944e-38, %v612_v4  ;;  %vm611_vm9 = vcmp.eq.f32.partialorder %v610_v5, 8.507059e+37 }
 0xe5e   :  { %v2109_v63 = vpop.eup %2108 }
 0xe5f   :  { %v602_v0 = vmul.f32 %v2109_v63, %v600_v62  ;;  %vm607_vm4 = vweird.f32 %v2109_v63 }
 0xe60   :  { %vm608_vm8 = vmor %vm606_vm5, %vm607_vm4 }
 0xe61   :  { %v603_v1 = vsub.f32 1.0, %v602_v0 }
 0xe63   :  { %v604_v2 = vmul.f32 %v2109_v63, %v603_v1 }
 0xe65   :  { %v605_v3 = vadd.f32 %v2109_v63, %v604_v2 }
 0xe67   :  { %v609_v7 = vsel %vm608_vm8, %v2109_v63, %v605_v3 }
 0xe68   :  { %v614_v11 = vsel %vm611_vm9, %v613_v8, %v609_v7 }
 0xe69   :  { %v620_v14 = vmul.f32 %v618_v13, %v614_v11 }
 0xec6   :  { %v623_v10 = vpop.permute.xlu0 %622 }
 0xec7   :  { %v625_v12 = vmul.f32 %v623_v10, %v614_v11 }
 0xec9   :  { %627 = vrot.lane.b32.xlu1 %v625_v12, %s2458_s29 }
 0xf3b   :  { %v628_v15 = vpop.permute.xlu1 %627 }
 0xf3c   :  { %v630_v16 = vadd.f32 %v628_v15, %v620_v14 }
 0xf3e   :  { %2110 = vtanh.f32 %v630_v16  ;;  %v688_v41 = vrot.slane %v630_v16, 7 }
 0xf44   :  { %v2111_v17 = vpop.eup %2110 }
 0xf45   :  { %633 = vrot.lane.b32.xlu2 %v2111_v17, %s2458_s29 }
 0xf9f   :  { %v634_v18 = vpop.permute.xlu2 %633 }
 0xfa0   :  { %v636_v19 = vmul.f32 %v634_v18, %v614_v11 }
 0xfa2   :  { %v638_v20 = vrot.slane %v636_v19, 6  ;;  %v2607_v21 = vsel %vm716_vm10, %v715_v54, %v636_v19 }
 0xfa4   :  { %639 = vrot.lane.b32.xlu0 %v638_v20, %s2459_s3 }
0x1016   :  { %v640_v22 = vpop.permute.xlu0 %639 }
0x1017   :  { %2005 = vmatmul.msk.f32.vlgmr.msra.gmra.mxu0 %vm156_vm6, %v640_v22 }
0x1018   :  { %1182 = vmatpush.msra.mxu0 %v727_v46 }
0x101a   :  { %1183 = vmatpush.msra.mxu0 %v726_v47 }
0x101c   :  { %1184 = vmatpush.msra.mxu0 %v725_v50 }
0x101e   :  { %1185 = vmatpush.msra.mxu0 %v724_v52 }
0x1094   :  { %v660_v23 = vpop.f32.mrf.mxu0 }
0x1095   :  { %v664_v24 = vrot.slane %v660_v23, 1 }
0x1097   :  { %v666_v25 = vadd.f32 %v664_v24, %v2555_v9 }
0x1099   :  { %2112 = vtanh.f32 %v666_v25  ;;  %v2006_v27 = vmul.f32 -1.442695, %v666_v25 }
0x109b   :  { %2114 = vpow2.f32 %v2006_v27 }
0x109f   :  { %v2113_v26 = vpop.eup %2112 }
0x10a0   :  { %692 = vrot.lane.b32.xlu1 %v2113_v26, %s2458_s29 }
0x10a1   :  { %v2115_v28 = vpop.eup %2114 }
0x10a2   :  { %v670_v29 = vadd.f32 1.0, %v2115_v28 }
0x10a4   :  { %2116 = vrcp.f32 %v670_v29  ;;  %v682_v36 = vand.u32 2147483648, %v670_v29  ;;  %vm676_vm12 = vweird.f32 %v670_v29  ;;  %v680_v37 = vand.u32 2147483647, %v670_v29 }
0x10a6   :  { %v683_v33 = vor.u32 1.1754944e-38, %v682_v36  ;;  %vm681_vm14 = vcmp.eq.f32.partialorder %v680_v37, 8.507059e+37 }
0x10aa   :  { %v2117_v30 = vpop.eup %2116 }
0x10ab   :  { %v672_v31 = vmul.f32 %v2117_v30, %v670_v29  ;;  %vm677_vm11 = vweird.f32 %v2117_v30 }
0x10ac   :  { %vm678_vm13 = vmor %vm676_vm12, %vm677_vm11 }
0x10ad   :  { %v673_v32 = vsub.f32 1.0, %v672_v31 }
0x10af   :  { %v674_v34 = vmul.f32 %v2117_v30, %v673_v32 }
0x10b1   :  { %v675_v35 = vadd.f32 %v2117_v30, %v674_v34 }
0x10b3   :  { %v679_v9 = vsel %vm678_vm13, %v2117_v30, %v675_v35 }
0x10b4   :  { %v684_v39 = vsel %vm681_vm14, %v683_v33, %v679_v9 }
0x10b5   :  { %v690_v42 = vmul.f32 %v688_v41, %v684_v39 }
0x1112   :  { %v693_v38 = vpop.permute.xlu1 %692 }
0x1113   :  { %v695_v40 = vmul.f32 %v693_v38, %v684_v39 }
0x1115   :  { %697 = vrot.lane.b32.xlu2 %v695_v40, %s2458_s29 }
0x116f   :  { %v698_v43 = vpop.permute.xlu2 %697 }
0x1170   :  { %v2614_v44 = vadd.f32 %v698_v43, %v690_v42 }
0x1172   :  { %2118 = vtanh.f32 %v2614_v44 }
0x1178   :  { %v2119_v45 = vpop.eup %2118 }
0x1179   :  { %703 = vrot.lane.b32.xlu0 %v2119_v45, %s2458_s29 }
0x11eb   :  { %v704_v54 = vpop.permute.xlu0 %703 }
0x11ec   :  { %v2619_v55 = vmul.f32 %v704_v54, %v684_v39 }
0x11ee   :  { %v719_v56 = vsel %vm718_vm2, %v2607_v21, %v2619_v55 }
0x11ef   :  { %733 = vrot.lane.b32.xlu1 %v719_v56, %s2459_s3 }
0x1261   :  { %v734_v57 = vpop.permute.xlu1 %733 }
0x1262   :  { %2007 = vmatmul.msk.f32.vlgmr.msra.gmra.mxu1 %vm156_vm6, %v734_v57 }
0x1263   :  { %1252 = vmatpush.msra.mxu1 %v727_v46 }
0x1265   :  { %1253 = vmatpush.msra.mxu1 %v726_v47 }
0x1267   :  { %1254 = vmatpush.msra.mxu1 %v725_v50 }
0x1269   :  { %1255 = vmatpush.msra.mxu1 %v724_v52 }
0x12df   :  { %v754_v59 = vpop.f32.mrf.mxu1 }
0x12e0   :  { %v2629_v61 = vadd.f32 %v2054_v58, %v754_v59 }
0x12e2   :  { %v777_v62 = vadd.f32 %v774_v60, %v2629_v61 }
0x12e4   :  { %2120 = vtanh.f32 %v777_v62  ;;  %v2008_v0 = vmul.f32 -1.442695, %v777_v62 }
0x12e6   :  { %2122 = vpow2.f32 %v2008_v0 }
0x12ea   :  { %v2121_v63 = vpop.eup %2120 }
0x12eb   :  { %800 = vrot.lane.b32.xlu2 %v2121_v63, %s2458_s29 }
0x12ec   :  { %v2123_v1 = vpop.eup %2122 }
0x12ed   :  { %v781_v2 = vadd.f32 1.0, %v2123_v1 }
0x12ef   :  { %2124 = vrcp.f32 %v781_v2  ;;  %v793_v10 = vand.u32 2147483648, %v781_v2  ;;  %vm787_vm5 = vweird.f32 %v781_v2  ;;  %v791_v11 = vand.u32 2147483647, %v781_v2 }
0x12f1   :  { %v794_v13 = vor.u32 1.1754944e-38, %v793_v10  ;;  %vm792_vm9 = vcmp.eq.f32.partialorder %v791_v11, 8.507059e+37 }
0x12f5   :  { %v2125_v3 = vpop.eup %2124 }
0x12f6   :  { %v783_v4 = vmul.f32 %v2125_v3, %v781_v2  ;;  %vm788_vm4 = vweird.f32 %v2125_v3 }
0x12f7   :  { %vm789_vm8 = vmor %vm787_vm5, %vm788_vm4 }
0x12f8   :  { %v784_v5 = vsub.f32 1.0, %v783_v4 }
0x12fa   :  { %v785_v7 = vmul.f32 %v2125_v3, %v784_v5 }
0x12fc   :  { %v786_v8 = vadd.f32 %v2125_v3, %v785_v7 }
0x12fe   :  { %v790_v12 = vsel %vm789_vm8, %v2125_v3, %v786_v8 }
0x12ff   :  { %v795_v15 = vsel %vm792_vm9, %v794_v13, %v790_v12 }
0x1300   :  { %v798_v17 = vmul.f32 0.0, %v795_v15 }
0x1345   :  { %v801_v14 = vpop.permute.xlu2 %800 }
0x1346   :  { %v803_v16 = vmul.f32 %v801_v14, %v795_v15 }
0x1348   :  { %805 = vrot.lane.b32.xlu0 %v803_v16, %s2458_s29 }
0x13ba   :  { %v806_v18 = vpop.permute.xlu0 %805 }
0x13bb   :  { %v808_v19 = vadd.f32 %v806_v18, %v798_v17 }
0x13bd   :  { %2126 = vtanh.f32 %v808_v19  ;;  %v865_v42 = vrot.slane %v808_v19, 7 }
0x13c3   :  { %v2127_v20 = vpop.eup %2126 }
0x13c4   :  { %811 = vrot.lane.b32.xlu1 %v2127_v20, %s2458_s29 }
0x1436   :  { %v812_v21 = vpop.permute.xlu1 %811 }
0x1437   :  { %v2635_v22 = vmul.f32 %v812_v21, %v795_v15 }
0x1439   :  { %816 = vrot.lane.b32.xlu2 %v2635_v22, %s2459_s3 }
0x1493   :  { %v817_v23 = vpop.permute.xlu2 %816 }
0x1494   :  { %2009 = vmatmul.msk.f32.vlgmr.msra.gmra.mxu3 %vm156_vm6, %v817_v23 }
0x1517   :  { %v837_v24 = vpop.f32.mrf.mxu3 }
0x1518   :  { %v841_v25 = vrot.slane %v837_v24, 7 }
0x151a   :  { %v843_v26 = vadd.f32 %v841_v25, %v2629_v61 }
0x151c   :  { %2128 = vtanh.f32 %v843_v26  ;;  %v2010_v28 = vmul.f32 -1.442695, %v843_v26 }
0x151e   :  { %2130 = vpow2.f32 %v2010_v28 }
0x1522   :  { %v2129_v27 = vpop.eup %2128 }
0x1523   :  { %869 = vrot.lane.b32.xlu0 %v2129_v27, %s2458_s29 }
0x1524   :  { %v2131_v29 = vpop.eup %2130 }
0x1525   :  { %v847_v30 = vadd.f32 1.0, %v2131_v29 }
0x1527   :  { %2132 = vrcp.f32 %v847_v30  ;;  %v859_v37 = vand.u32 2147483648, %v847_v30  ;;  %vm853_vm12 = vweird.f32 %v847_v30  ;;  %v857_v9 = vand.u32 2147483647, %v847_v30 }
0x1529   :  { %v860_v38 = vor.u32 1.1754944e-38, %v859_v37  ;;  %vm858_vm14 = vcmp.eq.f32.partialorder %v857_v9, 8.507059e+37 }
0x152d   :  { %v2133_v31 = vpop.eup %2132 }
0x152e   :  { %v849_v32 = vmul.f32 %v2133_v31, %v847_v30  ;;  %vm854_vm11 = vweird.f32 %v2133_v31 }
0x152f   :  { %vm855_vm13 = vmor %vm853_vm12, %vm854_vm11 }
0x1530   :  { %v850_v34 = vsub.f32 1.0, %v849_v32 }
0x1532   :  { %v851_v35 = vmul.f32 %v2133_v31, %v850_v34 }
0x1534   :  { %v852_v36 = vadd.f32 %v2133_v31, %v851_v35 }
0x1536   :  { %v856_v33 = vsel %vm855_vm13, %v2133_v31, %v852_v36 }
0x1537   :  { %v861_v40 = vsel %vm858_vm14, %v860_v38, %v856_v33 }
0x1538   :  { %v867_v43 = vmul.f32 %v865_v42, %v861_v40 }
0x1595   :  { %v870_v39 = vpop.permute.xlu0 %869 }
0x1596   :  { %v872_v41 = vmul.f32 %v870_v39, %v861_v40 }
0x1598   :  { %874 = vrot.lane.b32.xlu1 %v872_v41, %s2458_s29 }
0x160a   :  { %v875_v45 = vpop.permute.xlu1 %874 }
0x160b   :  { %v877_v46 = vadd.f32 %v875_v45, %v867_v43 }
0x160d   :  { %2134 = vtanh.f32 %v877_v46  ;;  %v935_v11 = vrot.slane %v877_v46, 7 }
0x1613   :  { %v2135_v47 = vpop.eup %2134 }
0x1614   :  { %880 = vrot.lane.b32.xlu2 %v2135_v47, %s2458_s29 }
0x166e   :  { %v881_v48 = vpop.permute.xlu2 %880 }
0x166f   :  { %v883_v49 = vmul.f32 %v881_v48, %v861_v40 }
0x1671   :  { %v885_v50 = vrot.slane %v883_v49, 1  ;;  %v1304_v18 = vsel %vm707_vm15, %v2635_v22, %v883_v49 }
0x1673   :  { %886 = vrot.lane.b32.xlu0 %v885_v50, %s2459_s3 }
0x16e5   :  { %v887_v51 = vpop.permute.xlu0 %886 }
0x16e6   :  { %2011 = vmatmul.msk.f32.vlgmr.msrb.gmra.mxu0 %vm156_vm6, %v887_v51 }
0x1763   :  { %v907_v52 = vpop.f32.mrf.mxu0 }
0x1764   :  { %v911_v53 = vrot.slane %v907_v52, 6 }
0x1766   :  { %v913_v54 = vadd.f32 %v911_v53, %v2629_v61 }
0x1768   :  { %2136 = vtanh.f32 %v913_v54  ;;  %v2012_v57 = vmul.f32 -1.442695, %v913_v54 }
0x176a   :  { %2138 = vpow2.f32 %v2012_v57 }
0x176e   :  { %v2137_v56 = vpop.eup %2136 }
0x176f   :  { %939 = vrot.lane.b32.xlu1 %v2137_v56, %s2458_s29 }
0x1770   :  { %v2139_v58 = vpop.eup %2138 }
0x1771   :  { %v917_v59 = vadd.f32 1.0, %v2139_v58 }
0x1773   :  { %2140 = vrcp.f32 %v917_v59  ;;  %v929_v2 = vand.u32 2147483648, %v917_v59  ;;  %vm923_vm5 = vweird.f32 %v917_v59  ;;  %v927_v3 = vand.u32 2147483647, %v917_v59 }
0x1775   :  { %v930_v5 = vor.u32 1.1754944e-38, %v929_v2  ;;  %vm928_vm9 = vcmp.eq.f32.partialorder %v927_v3, 8.507059e+37 }
0x1779   :  { %v2141_v60 = vpop.eup %2140 }
0x177a   :  { %v919_v62 = vmul.f32 %v2141_v60, %v917_v59  ;;  %vm924_vm4 = vweird.f32 %v2141_v60 }
0x177b   :  { %vm925_vm8 = vmor %vm923_vm5, %vm924_vm4 }
0x177c   :  { %v920_v63 = vsub.f32 1.0, %v919_v62 }
0x177e   :  { %v921_v0 = vmul.f32 %v2141_v60, %v920_v63 }
0x1780   :  { %v922_v1 = vadd.f32 %v2141_v60, %v921_v0 }
0x1782   :  { %v926_v4 = vsel %vm925_vm8, %v2141_v60, %v922_v1 }
0x1783   :  { %v931_v8 = vsel %vm928_vm9, %v930_v5, %v926_v4 }
0x1784   :  { %v937_v12 = vmul.f32 %v935_v11, %v931_v8 }
0x17e1   :  { %v940_v7 = vpop.permute.xlu1 %939 }
0x17e2   :  { %v942_v10 = vmul.f32 %v940_v7, %v931_v8 }
0x17e4   :  { %944 = vrot.lane.b32.xlu2 %v942_v10, %s2458_s29 }
0x183e   :  { %v945_v13 = vpop.permute.xlu2 %944 }
0x183f   :  { %v947_v14 = vadd.f32 %v945_v13, %v937_v12 }
0x1841   :  { %2142 = vtanh.f32 %v947_v14  ;;  %v1005_v40 = vrot.slane %v947_v14, 7 }
0x1847   :  { %v2143_v15 = vpop.eup %2142 }
0x1848   :  { %950 = vrot.lane.b32.xlu0 %v2143_v15, %s2458_s29 }
0x18ba   :  { %v951_v16 = vpop.permute.xlu0 %950 }
0x18bb   :  { %v953_v17 = vmul.f32 %v951_v16, %v931_v8 }
0x18bd   :  { %v955_v19 = vrot.slane %v953_v17, 2  ;;  %v1305_v20 = vsel %vm709_vm1, %v1304_v18, %v953_v17 }
0x18bf   :  { %956 = vrot.lane.b32.xlu1 %v955_v19, %s2459_s3 }
0x1931   :  { %v957_v21 = vpop.permute.xlu1 %956 }
0x1932   :  { %2013 = vmatmul.msk.f32.vlgmr.msrb.gmra.mxu1 %vm156_vm6, %v957_v21 }
0x19af   :  { %v977_v23 = vpop.f32.mrf.mxu1 }
0x19b0   :  { %v981_v24 = vrot.slane %v977_v23, 5 }
0x19b2   :  { %v983_v25 = vadd.f32 %v981_v24, %v2629_v61 }
0x19b4   :  { %2144 = vtanh.f32 %v983_v25  ;;  %v2014_v27 = vmul.f32 -1.442695, %v983_v25 }
0x19b6   :  { %2146 = vpow2.f32 %v2014_v27 }
0x19ba   :  { %v2145_v26 = vpop.eup %2144 }
0x19bb   :  { %1009 = vrot.lane.b32.xlu2 %v2145_v26, %s2458_s29 }
0x19bc   :  { %v2147_v28 = vpop.eup %2146 }
0x19bd   :  { %v987_v22 = vadd.f32 1.0, %v2147_v28 }
0x19bf   :  { %2148 = vrcp.f32 %v987_v22  ;;  %v999_v35 = vand.u32 2147483648, %v987_v22  ;;  %vm993_vm12 = vweird.f32 %v987_v22  ;;  %v997_v36 = vand.u32 2147483647, %v987_v22 }
0x19c1   :  { %v1000_v9 = vor.u32 1.1754944e-38, %v999_v35  ;;  %vm998_vm14 = vcmp.eq.f32.partialorder %v997_v36, 8.507059e+37 }
0x19c5   :  { %v2149_v29 = vpop.eup %2148 }
0x19c6   :  { %v989_v30 = vmul.f32 %v2149_v29, %v987_v22  ;;  %vm994_vm11 = vweird.f32 %v2149_v29 }
0x19c7   :  { %vm995_vm13 = vmor %vm993_vm12, %vm994_vm11 }
0x19c8   :  { %v990_v31 = vsub.f32 1.0, %v989_v30 }
0x19ca   :  { %v991_v32 = vmul.f32 %v2149_v29, %v990_v31 }
0x19cc   :  { %v992_v34 = vadd.f32 %v2149_v29, %v991_v32 }
0x19ce   :  { %v996_v37 = vsel %vm995_vm13, %v2149_v29, %v992_v34 }
0x19cf   :  { %v1001_v38 = vsel %vm998_vm14, %v1000_v9, %v996_v37 }
0x19d0   :  { %v1007_v41 = vmul.f32 %v1005_v40, %v1001_v38 }
0x1a15   :  { %v1010_v33 = vpop.permute.xlu2 %1009 }
0x1a16   :  { %v1012_v39 = vmul.f32 %v1010_v33, %v1001_v38 }
0x1a18   :  { %1014 = vrot.lane.b32.xlu0 %v1012_v39, %s2458_s29 }
0x1a8a   :  { %v1015_v42 = vpop.permute.xlu0 %1014 }
0x1a8b   :  { %v1017_v43 = vadd.f32 %v1015_v42, %v1007_v41 }
0x1a8d   :  { %2150 = vtanh.f32 %v1017_v43  ;;  %v1075_v10 = vrot.slane %v1017_v43, 7 }
0x1a93   :  { %v2151_v45 = vpop.eup %2150 }
0x1a94   :  { %1020 = vrot.lane.b32.xlu1 %v2151_v45, %s2458_s29 }
0x1b06   :  { %v1021_v46 = vpop.permute.xlu1 %1020 }
0x1b07   :  { %v1023_v47 = vmul.f32 %v1021_v46, %v1001_v38 }
0x1b09   :  { %v1025_v48 = vrot.slane %v1023_v47, 3  ;;  %v1306_v49 = vsel %vm711_vm7, %v1305_v20, %v1023_v47 }
0x1b0b   :  { %1026 = vrot.lane.b32.xlu2 %v1025_v48, %s2459_s3 }
0x1b65   :  { %v1027_v50 = vpop.permute.xlu2 %1026 }
0x1b66   :  { %2015 = vmatmul.msk.f32.vlgmr.msrb.gmra.mxu2 %vm156_vm6, %v1027_v50 }
0x1be9   :  { %v1047_v51 = vpop.f32.mrf.mxu2 }
0x1bea   :  { %v1051_v52 = vrot.slane %v1047_v51, 4 }
0x1bec   :  { %v1053_v53 = vadd.f32 %v1051_v52, %v2629_v61 }
0x1bee   :  { %2152 = vtanh.f32 %v1053_v53  ;;  %v2016_v56 = vmul.f32 -1.442695, %v1053_v53 }
0x1bf0   :  { %2154 = vpow2.f32 %v2016_v56 }
0x1bf4   :  { %v2153_v54 = vpop.eup %2152 }
0x1bf5   :  { %1079 = vrot.lane.b32.xlu0 %v2153_v54, %s2458_s29 }
0x1bf6   :  { %v2155_v57 = vpop.eup %2154 }
0x1bf7   :  { %v1057_v58 = vadd.f32 1.0, %v2155_v57 }
0x1bf9   :  { %2156 = vrcp.f32 %v1057_v58  ;;  %v1069_v1 = vand.u32 2147483648, %v1057_v58  ;;  %vm1063_vm5 = vweird.f32 %v1057_v58  ;;  %v1067_v2 = vand.u32 2147483647, %v1057_v58 }
0x1bfb   :  { %v1070_v4 = vor.u32 1.1754944e-38, %v1069_v1  ;;  %vm1068_vm9 = vcmp.eq.f32.partialorder %v1067_v2, 8.507059e+37 }
0x1bff   :  { %v2157_v59 = vpop.eup %2156 }
0x1c00   :  { %v1059_v60 = vmul.f32 %v2157_v59, %v1057_v58  ;;  %vm1064_vm4 = vweird.f32 %v2157_v59 }
0x1c01   :  { %vm1065_vm8 = vmor %vm1063_vm5, %vm1064_vm4 }
0x1c02   :  { %v1060_v62 = vsub.f32 1.0, %v1059_v60 }
0x1c04   :  { %v1061_v63 = vmul.f32 %v2157_v59, %v1060_v62 }
0x1c06   :  { %v1062_v0 = vadd.f32 %v2157_v59, %v1061_v63 }
0x1c08   :  { %v1066_v3 = vsel %vm1065_vm8, %v2157_v59, %v1062_v0 }
0x1c09   :  { %v1071_v7 = vsel %vm1068_vm9, %v1070_v4, %v1066_v3 }
0x1c0a   :  { %v1077_v11 = vmul.f32 %v1075_v10, %v1071_v7 }
0x1c67   :  { %v1080_v5 = vpop.permute.xlu0 %1079 }
0x1c68   :  { %v1082_v8 = vmul.f32 %v1080_v5, %v1071_v7 }
0x1c6a   :  { %1084 = vrot.lane.b32.xlu1 %v1082_v8, %s2458_s29 }
0x1cdc   :  { %v1085_v12 = vpop.permute.xlu1 %1084 }
0x1cdd   :  { %v1087_v13 = vadd.f32 %v1085_v12, %v1077_v11 }
0x1cdf   :  { %2158 = vtanh.f32 %v1087_v13  ;;  %v1145_v38 = vrot.slane %v1087_v13, 7 }
0x1ce5   :  { %v2159_v14 = vpop.eup %2158 }
0x1ce6   :  { %1090 = vrot.lane.b32.xlu2 %v2159_v14, %s2458_s29 }
0x1d40   :  { %v1091_v15 = vpop.permute.xlu2 %1090 }
0x1d41   :  { %v1093_v16 = vmul.f32 %v1091_v15, %v1071_v7 }
0x1d43   :  { %v1095_v17 = vrot.slane %v1093_v16, 4  ;;  %v1307_v18 = vsel %vm132_vm0, %v1306_v49, %v1093_v16 }
0x1d45   :  { %1096 = vrot.lane.b32.xlu0 %v1095_v17, %s2459_s3 }
0x1db7   :  { %v1097_v19 = vpop.permute.xlu0 %1096 }
0x1db8   :  { %2017 = vmatmul.msk.f32.vlgmr.msrb.gmra.mxu3 %vm156_vm6, %v1097_v19 }
0x1e3b   :  { %v1117_v20 = vpop.f32.mrf.mxu3 }
0x1e3c   :  { %v1121_v21 = vrot.slane %v1117_v20, 3 }
0x1e3e   :  { %v1123_v23 = vadd.f32 %v1121_v21, %v2629_v61 }
0x1e40   :  { %2160 = vtanh.f32 %v1123_v23  ;;  %v2018_v25 = vmul.f32 -1.442695, %v1123_v23 }
0x1e42   :  { %2162 = vpow2.f32 %v2018_v25 }
0x1e46   :  { %v2161_v24 = vpop.eup %2160 }
0x1e47   :  { %1149 = vrot.lane.b32.xlu1 %v2161_v24, %s2458_s29 }
0x1e48   :  { %v2163_v26 = vpop.eup %2162 }
0x1e49   :  { %v1127_v27 = vadd.f32 1.0, %v2163_v26 }
0x1e4b   :  { %2164 = vrcp.f32 %v1127_v27  ;;  %v1139_v32 = vand.u32 2147483648, %v1127_v27  ;;  %vm1133_vm12 = vweird.f32 %v1127_v27  ;;  %v1137_v34 = vand.u32 2147483647, %v1127_v27 }
0x1e4d   :  { %v1140_v36 = vor.u32 1.1754944e-38, %v1139_v32  ;;  %vm1138_vm14 = vcmp.eq.f32.partialorder %v1137_v34, 8.507059e+37 }
0x1e51   :  { %v2165_v28 = vpop.eup %2164 }
0x1e52   :  { %v1129_v22 = vmul.f32 %v2165_v28, %v1127_v27  ;;  %vm1134_vm11 = vweird.f32 %v2165_v28 }
0x1e53   :  { %vm1135_vm13 = vmor %vm1133_vm12, %vm1134_vm11 }
0x1e54   :  { %v1130_v29 = vsub.f32 1.0, %v1129_v22 }
0x1e56   :  { %v1131_v30 = vmul.f32 %v2165_v28, %v1130_v29 }
0x1e58   :  { %v1132_v31 = vadd.f32 %v2165_v28, %v1131_v30 }
0x1e5a   :  { %v1136_v35 = vsel %vm1135_vm13, %v2165_v28, %v1132_v31 }
0x1e5b   :  { %v1141_v9 = vsel %vm1138_vm14, %v1140_v36, %v1136_v35 }
0x1e5c   :  { %v1147_v39 = vmul.f32 %v1145_v38, %v1141_v9 }
0x1eb9   :  { %v1150_v37 = vpop.permute.xlu1 %1149 }
0x1eba   :  { %v1152_v33 = vmul.f32 %v1150_v37, %v1141_v9 }
0x1ebc   :  { %1154 = vrot.lane.b32.xlu2 %v1152_v33, %s2458_s29 }
0x1f16   :  { %v1155_v40 = vpop.permute.xlu2 %1154 }
0x1f17   :  { %v1157_v41 = vadd.f32 %v1155_v40, %v1147_v39  ;;  %v1925_v39 = vrot.slane %v2614_v44, 7  ;;  %v1311_v44 = vld [vmem:[#allocation8] sm:$0xff] }
0x1f19   :  { %2166 = vtanh.f32 %v1157_v41  ;;  %v1215_v7 = vrot.slane %v1157_v41, 7 }
0x1f1f   :  { %v2167_v42 = vpop.eup %2166 }
0x1f20   :  { %1160 = vrot.lane.b32.xlu0 %v2167_v42, %s2458_s29 }
0x1f92   :  { %v1161_v43 = vpop.permute.xlu0 %1160 }
0x1f93   :  { %v1163_v45 = vmul.f32 %v1161_v43, %v1141_v9  ;;  %v1314_v43 = vld [vmem:[#allocation8 + $0x18] sm:$0xff] }
0x1f94   :  { %1340 = vmatpush.msra.mxu2 %v1314_v43 }
0x1f95   :  { %v1165_v46 = vrot.slane %v1163_v45, 5  ;;  %v1308_v47 = vsel %vm714_vm3, %v1307_v18, %v1163_v45  ;;  %v1313_v45 = vld [vmem:[#allocation8 + $0x10] sm:$0xff] }
0x1f96   :  { %1341 = vmatpush.msra.mxu2 %v1313_v45 }
0x1f97   :  { %1166 = vrot.lane.b32.xlu1 %v1165_v46, %s2459_s3  ;;  %v1318_v46 = vld [vmem:[#allocation10 + $0x18] sm:$0xff] }
0x1f98   :  { %1360 = vmatpush.msra.mxu3 %v1318_v46  ;;  %1423 = vmatpush.msrb.mxu0 %v1318_v46 }
0x1f99   :  { %1493 = vmatpush.msrb.mxu1 %v1318_v46 }
0x2009   :  { %v1167_v48 = vpop.permute.xlu1 %1166 }
0x200a   :  { %2019 = vmatmul.msk.f32.vlgmr.msra.gmra.mxu0 %vm156_vm6, %v1167_v48  ;;  %v1312_v48 = vld [vmem:[#allocation8 + $0x8] sm:$0xff] }
0x200b   :  { %1342 = vmatpush.msra.mxu2 %v1312_v48 }
0x200d   :  { %1343 = vmatpush.msra.mxu2 %v1311_v44 }
0x200f   :  { %1563 = vmatpush.msrb.mxu2 %v1318_v46 }
0x2087   :  { %v1187_v49 = vpop.f32.mrf.mxu0 }
0x2088   :  { %v1191_v50 = vrot.slane %v1187_v49, 2  ;;  %v1316_v49 = vld [vmem:[#allocation10 + $0x8] sm:$0xff] }
0x208a   :  { %v1193_v51 = vadd.f32 %v1191_v50, %v2629_v61 }
0x208c   :  { %2168 = vtanh.f32 %v1193_v51  ;;  %v2020_v53 = vmul.f32 -1.442695, %v1193_v51 }
0x208e   :  { %2170 = vpow2.f32 %v2020_v53 }
0x2092   :  { %v2169_v52 = vpop.eup %2168 }
0x2093   :  { %1219 = vrot.lane.b32.xlu2 %v2169_v52, %s2458_s29  ;;  %v1908_v52 = vrot.slane %v2619_v55, 7 }
0x2094   :  { %v2171_v54 = vpop.eup %2170 }
0x2095   :  { %v1197_v56 = vadd.f32 1.0, %v2171_v54 }
0x2097   :  { %2172 = vrcp.f32 %v1197_v56  ;;  %v1209_v63 = vand.u32 2147483648, %v1197_v56  ;;  %vm1203_vm5 = vweird.f32 %v1197_v56  ;;  %v1207_v0 = vand.u32 2147483647, %v1197_v56 }
0x2099   :  { %v1210_v2 = vor.u32 1.1754944e-38, %v1209_v63  ;;  %vm1208_vm9 = vcmp.eq.f32.partialorder %v1207_v0, 8.507059e+37 }
0x209d   :  { %v2173_v57 = vpop.eup %2172 }
0x209e   :  { %v1199_v58 = vmul.f32 %v2173_v57, %v1197_v56  ;;  %vm1204_vm4 = vweird.f32 %v2173_v57 }
0x209f   :  { %vm1205_vm8 = vmor %vm1203_vm5, %vm1204_vm4 }
0x20a0   :  { %v1200_v59 = vsub.f32 1.0, %v1199_v58 }
0x20a2   :  { %v1201_v60 = vmul.f32 %v2173_v57, %v1200_v59 }
0x20a4   :  { %v1202_v62 = vadd.f32 %v2173_v57, %v1201_v60 }
0x20a6   :  { %v1206_v1 = vsel %vm1205_vm8, %v2173_v57, %v1202_v62  ;;  %v1315_v57 = vld [vmem:[#allocation10] sm:$0xff] }
0x20a7   :  { %v1211_v4 = vsel %vm1208_vm9, %v1210_v2, %v1206_v1 }
0x20a8   :  { %v1217_v8 = vmul.f32 %v1215_v7, %v1211_v4 }
0x20ed   :  { %v1220_v3 = vpop.permute.xlu2 %1219 }
0x20ee   :  { %v1222_v5 = vmul.f32 %v1220_v3, %v1211_v4 }
0x20f0   :  { %1224 = vrot.lane.b32.xlu0 %v1222_v5, %s2458_s29 }
0x2162   :  { %v1225_v10 = vpop.permute.xlu0 %1224 }
0x2163   :  { %v1227_v11 = vadd.f32 %v1225_v10, %v1217_v8 }
0x2165   :  { %2174 = vtanh.f32 %v1227_v11  ;;  %v1285_v37 = vrot.slane %v1227_v11, 7 }
0x216b   :  { %v2175_v12 = vpop.eup %2174 }
0x216c   :  { %1230 = vrot.lane.b32.xlu1 %v2175_v12, %s2458_s29 }
0x21de   :  { %v1231_v13 = vpop.permute.xlu1 %1230 }
0x21df   :  { %v1233_v14 = vmul.f32 %v1231_v13, %v1211_v4 }
0x21e1   :  { %v1235_v15 = vrot.slane %v1233_v14, 6  ;;  %v2681_v16 = vsel %vm716_vm10, %v1308_v47, %v1233_v14  ;;  %v1317_v47 = vld [vmem:[#allocation10 + $0x10] sm:$0xff] }
0x21e2   :  { %1361 = vmatpush.msra.mxu3 %v1317_v47  ;;  %1424 = vmatpush.msrb.mxu0 %v1317_v47 }
0x21e3   :  { %1236 = vrot.lane.b32.xlu2 %v1235_v15, %s2459_s3  ;;  %1494 = vmatpush.msrb.mxu1 %v1317_v47 }
0x21e4   :  { %1362 = vmatpush.msra.mxu3 %v1316_v49  ;;  %1425 = vmatpush.msrb.mxu0 %v1316_v49 }
0x21e5   :  { %1495 = vmatpush.msrb.mxu1 %v1316_v49  ;;  %1564 = vmatpush.msrb.mxu2 %v1317_v47 }
0x21e6   :  { %1363 = vmatpush.msra.mxu3 %v1315_v57  ;;  %1426 = vmatpush.msrb.mxu0 %v1315_v57 }
0x21e7   :  { %1565 = vmatpush.msrb.mxu2 %v1316_v49  ;;  %1364 = vmatmul.f32.vlgmr.msra.gmra.mxu3 %v2457_v6  ;;  %v2055_v6 = vld [vmem:[%s2789_s9] ss:$0 sm:$0xff]  ;;  %s2460_s9 = smov 96  }
0x21e8   :  { %1496 = vmatpush.msrb.mxu1 %v1315_v57  ;;  %1633 = vmatpush.msrb.mxu3 %v1318_v46 }
0x21e9   :  { %1566 = vmatpush.msrb.mxu2 %v1315_v57  ;;  %1703 = vmatpush.msra.mxu0 %v1318_v46 }
0x21ea   :  { %1634 = vmatpush.msrb.mxu3 %v1317_v47 }
0x21eb   :  { %1704 = vmatpush.msra.mxu0 %v1317_v47 }
0x21ec   :  { %1635 = vmatpush.msrb.mxu3 %v1316_v49 }
0x21ed   :  { %1705 = vmatpush.msra.mxu0 %v1316_v49 }
0x21ee   :  { %1636 = vmatpush.msrb.mxu3 %v1315_v57 }
0x21ef   :  { %1706 = vmatpush.msra.mxu0 %v1315_v57 }
0x223d   :  { %v1237_v17 = vpop.permute.xlu2 %1236 }
0x223e   :  { %2021 = vmatmul.msk.f32.vlgmr.msra.gmra.mxu1 %vm156_vm6, %v1237_v17 }
0x223f   :  { %1773 = vmatpush.msra.mxu1 %v1318_v46 }
0x2241   :  { %1774 = vmatpush.msra.mxu1 %v1317_v47 }
0x2243   :  { %1775 = vmatpush.msra.mxu1 %v1316_v49 }
0x2245   :  { %1776 = vmatpush.msra.mxu1 %v1315_v57 }
0x226a   :  { %v1365_v59 = vpop.f32.mrf.mxu3 }
0x22bb   :  { %v1257_v18 = vpop.f32.mrf.mxu1 }
0x22bc   :  { %v1261_v19 = vrot.slane %v1257_v18, 1 }
0x22be   :  { %v1263_v20 = vadd.f32 %v1261_v19, %v2629_v61 }
0x22c0   :  { %2176 = vtanh.f32 %v1263_v20  ;;  %v2022_v23 = vmul.f32 -1.442695, %v1263_v20 }
0x22c2   :  { %2178 = vpow2.f32 %v2022_v23 }
0x22c6   :  { %v2177_v21 = vpop.eup %2176 }
0x22c7   :  { %1289 = vrot.lane.b32.xlu0 %v2177_v21, %s2458_s29 }
0x22c8   :  { %v2179_v24 = vpop.eup %2178 }
0x22c9   :  { %v1267_v25 = vadd.f32 1.0, %v2179_v24 }
0x22cb   :  { %2180 = vrcp.f32 %v1267_v25  ;;  %v1279_v30 = vand.u32 2147483648, %v1267_v25  ;;  %vm1273_vm12 = vweird.f32 %v1267_v25  ;;  %v1277_v31 = vand.u32 2147483647, %v1267_v25 }
0x22cd   :  { %v1280_v32 = vor.u32 1.1754944e-38, %v1279_v30  ;;  %vm1278_vm14 = vcmp.eq.f32.partialorder %v1277_v31, 8.507059e+37 }
0x22d1   :  { %v2181_v26 = vpop.eup %2180 }
0x22d2   :  { %v1269_v27 = vmul.f32 %v2181_v26, %v1267_v25  ;;  %vm1274_vm11 = vweird.f32 %v2181_v26 }
0x22d3   :  { %vm1275_vm13 = vmor %vm1273_vm12, %vm1274_vm11 }
0x22d4   :  { %v1270_v28 = vsub.f32 1.0, %v1269_v27 }
0x22d6   :  { %v1271_v22 = vmul.f32 %v2181_v26, %v1270_v28 }
0x22d8   :  { %v1272_v29 = vadd.f32 %v2181_v26, %v1271_v22 }
0x22da   :  { %v1276_v61 = vsel %vm1275_vm13, %v2181_v26, %v1272_v29 }
0x22db   :  { %v1281_v35 = vsel %vm1278_vm14, %v1280_v32, %v1276_v61 }
0x22dc   :  { %v1287_v9 = vmul.f32 %v1285_v37, %v1281_v35 }
0x2339   :  { %v1290_v34 = vpop.permute.xlu0 %1289 }
0x233a   :  { %v1292_v36 = vmul.f32 %v1290_v34, %v1281_v35 }
0x233c   :  { %1294 = vrot.lane.b32.xlu1 %v1292_v36, %s2458_s29 }
0x23ae   :  { %v1295_v33 = vpop.permute.xlu1 %1294 }
0x23af   :  { %v1297_v38 = vadd.f32 %v1295_v33, %v1287_v9 }
0x23b1   :  { %2182 = vtanh.f32 %v1297_v38  ;;  %v1928_v40 = vrot.slane %v1297_v38, 6 }
0x23b3   :  { %v2690_v41 = vsel %vm707_vm15, %v1925_v39, %v1928_v40 }
0x23b7   :  { %v2183_v42 = vpop.eup %2182 }
0x23b8   :  { %1300 = vrot.lane.b32.xlu2 %v2183_v42, %s2458_s29 }
0x2412   :  { %v1301_v50 = vpop.permute.xlu2 %1300 }
0x2413   :  { %v1303_v51 = vmul.f32 %v1301_v50, %v1281_v35 }
0x2415   :  { %v1911_v53 = vrot.slane %v1303_v51, 6  ;;  %v1310_v54 = vsel %vm718_vm2, %v2681_v16, %v1303_v51 }
0x2416   :  { %1324 = vrot.lane.b32.xlu0 %v1310_v54, %s2459_s3 }
0x2417   :  { %v2698_v56 = vsel %vm707_vm15, %v1908_v52, %v1911_v53 }
0x2488   :  { %v1325_v55 = vpop.permute.xlu0 %1324 }
0x2489   :  { %2023 = vmatmul.msk.f32.vlgmr.msra.gmra.mxu2 %vm156_vm6, %v1325_v55 }
0x248a   :  { %1843 = vmatpush.msra.mxu2 %v1318_v46 }
0x248c   :  { %1844 = vmatpush.msra.mxu2 %v1317_v47 }
0x248e   :  { %1845 = vmatpush.msra.mxu2 %v1316_v49 }
0x2490   :  { %1846 = vmatpush.msra.mxu2 %v1315_v57 }
0x250c   :  { %v1345_v58 = vpop.f32.mrf.mxu2 }
0x250d   :  { %v2705_v60 = vadd.f32 %v2055_v6, %v1345_v58 }
0x250f   :  { %v1368_v62 = vadd.f32 %v1365_v59, %v2705_v60 }
0x2511   :  { %2184 = vtanh.f32 %v1368_v62  ;;  %v2024_v0 = vmul.f32 -1.442695, %v1368_v62 }
0x2513   :  { %2186 = vpow2.f32 %v2024_v0 }
0x2517   :  { %v2185_v63 = vpop.eup %2184 }
0x2518   :  { %1391 = vrot.lane.b32.xlu1 %v2185_v63, %s2458_s29 }
0x2519   :  { %v2187_v1 = vpop.eup %2186 }
0x251a   :  { %v1372_v2 = vadd.f32 1.0, %v2187_v1 }
0x251c   :  { %2188 = vrcp.f32 %v1372_v2  ;;  %v1384_v10 = vand.u32 2147483648, %v1372_v2  ;;  %vm1378_vm5 = vweird.f32 %v1372_v2  ;;  %v1382_v11 = vand.u32 2147483647, %v1372_v2 }
0x251e   :  { %v1385_v13 = vor.u32 1.1754944e-38, %v1384_v10  ;;  %vm1383_vm9 = vcmp.eq.f32.partialorder %v1382_v11, 8.507059e+37 }
0x2522   :  { %v2189_v3 = vpop.eup %2188 }
0x2523   :  { %v1374_v4 = vmul.f32 %v2189_v3, %v1372_v2  ;;  %vm1379_vm4 = vweird.f32 %v2189_v3 }
0x2524   :  { %vm1380_vm8 = vmor %vm1378_vm5, %vm1379_vm4 }
0x2525   :  { %v1375_v5 = vsub.f32 1.0, %v1374_v4 }
0x2527   :  { %v1376_v7 = vmul.f32 %v2189_v3, %v1375_v5 }
0x2529   :  { %v1377_v8 = vadd.f32 %v2189_v3, %v1376_v7 }
0x252b   :  { %v1381_v12 = vsel %vm1380_vm8, %v2189_v3, %v1377_v8 }
0x252c   :  { %v1386_v15 = vsel %vm1383_vm9, %v1385_v13, %v1381_v12 }
0x252d   :  { %v1389_v17 = vmul.f32 0.0, %v1386_v15 }
0x258a   :  { %v1392_v14 = vpop.permute.xlu1 %1391 }
0x258b   :  { %v1394_v16 = vmul.f32 %v1392_v14, %v1386_v15 }
0x258d   :  { %1396 = vrot.lane.b32.xlu2 %v1394_v16, %s2458_s29 }
0x25e7   :  { %v1397_v18 = vpop.permute.xlu2 %1396 }
0x25e8   :  { %v1399_v19 = vadd.f32 %v1397_v18, %v1389_v17 }
0x25ea   :  { %2190 = vtanh.f32 %v1399_v19  ;;  %v1456_v42 = vrot.slane %v1399_v19, 7 }
0x25f0   :  { %v2191_v20 = vpop.eup %2190 }
0x25f1   :  { %1402 = vrot.lane.b32.xlu0 %v2191_v20, %s2458_s29 }
0x2663   :  { %v1403_v21 = vpop.permute.xlu0 %1402 }
0x2664   :  { %v2711_v23 = vmul.f32 %v1403_v21, %v1386_v15 }
0x2666   :  { %1407 = vrot.lane.b32.xlu1 %v2711_v23, %s2459_s3 }
0x26d8   :  { %v1408_v24 = vpop.permute.xlu1 %1407 }
0x26d9   :  { %2025 = vmatmul.msk.f32.vlgmr.msrb.gmra.mxu0 %vm156_vm6, %v1408_v24 }
0x2756   :  { %v1428_v25 = vpop.f32.mrf.mxu0 }
0x2757   :  { %v1432_v26 = vrot.slane %v1428_v25, 7 }
0x2759   :  { %v1434_v27 = vadd.f32 %v1432_v26, %v2705_v60 }
0x275b   :  { %2192 = vtanh.f32 %v1434_v27  ;;  %v2026_v22 = vmul.f32 -1.442695, %v1434_v27 }
0x275d   :  { %2194 = vpow2.f32 %v2026_v22 }
0x2761   :  { %v2193_v28 = vpop.eup %2192 }
0x2762   :  { %1460 = vrot.lane.b32.xlu2 %v2193_v28, %s2458_s29 }
0x2763   :  { %v2195_v29 = vpop.eup %2194 }
0x2764   :  { %v1438_v30 = vadd.f32 1.0, %v2195_v29 }
0x2766   :  { %2196 = vrcp.f32 %v1438_v30  ;;  %v1450_v36 = vand.u32 2147483648, %v1438_v30  ;;  %vm1444_vm12 = vweird.f32 %v1438_v30  ;;  %v1448_v37 = vand.u32 2147483647, %v1438_v30 }
0x2768   :  { %v1451_v33 = vor.u32 1.1754944e-38, %v1450_v36  ;;  %vm1449_vm14 = vcmp.eq.f32.partialorder %v1448_v37, 8.507059e+37 }
0x276c   :  { %v2197_v31 = vpop.eup %2196 }
0x276d   :  { %v1440_v61 = vmul.f32 %v2197_v31, %v1438_v30  ;;  %vm1445_vm11 = vweird.f32 %v2197_v31 }
0x276e   :  { %vm1446_vm13 = vmor %vm1444_vm12, %vm1445_vm11 }
0x276f   :  { %v1441_v32 = vsub.f32 1.0, %v1440_v61 }
0x2771   :  { %v1442_v34 = vmul.f32 %v2197_v31, %v1441_v32 }
0x2773   :  { %v1443_v35 = vadd.f32 %v2197_v31, %v1442_v34 }
0x2775   :  { %v1447_v9 = vsel %vm1446_vm13, %v2197_v31, %v1443_v35 }
0x2776   :  { %v1452_v39 = vsel %vm1449_vm14, %v1451_v33, %v1447_v9 }
0x2777   :  { %v1458_v43 = vmul.f32 %v1456_v42, %v1452_v39 }
0x27bc   :  { %v1461_v38 = vpop.permute.xlu2 %1460 }
0x27bd   :  { %v1463_v40 = vmul.f32 %v1461_v38, %v1452_v39 }
0x27bf   :  { %1465 = vrot.lane.b32.xlu0 %v1463_v40, %s2458_s29 }
0x2831   :  { %v1466_v45 = vpop.permute.xlu0 %1465 }
0x2832   :  { %v1468_v46 = vadd.f32 %v1466_v45, %v1458_v43 }
0x2834   :  { %2198 = vtanh.f32 %v1468_v46  ;;  %v1526_v10 = vrot.slane %v1468_v46, 7 }
0x283a   :  { %v2199_v47 = vpop.eup %2198 }
0x283b   :  { %1471 = vrot.lane.b32.xlu1 %v2199_v47, %s2458_s29 }
0x28ad   :  { %v1472_v48 = vpop.permute.xlu1 %1471 }
0x28ae   :  { %v1474_v49 = vmul.f32 %v1472_v48, %v1452_v39 }
0x28b0   :  { %v1476_v44 = vrot.slane %v1474_v49, 1  ;;  %v1895_v17 = vsel %vm707_vm15, %v2711_v23, %v1474_v49 }
0x28b2   :  { %1477 = vrot.lane.b32.xlu2 %v1476_v44, %s2459_s3 }
0x290c   :  { %v1478_v50 = vpop.permute.xlu2 %1477 }
0x290d   :  { %2027 = vmatmul.msk.f32.vlgmr.msrb.gmra.mxu1 %vm156_vm6, %v1478_v50 }
0x298a   :  { %v1498_v51 = vpop.f32.mrf.mxu1 }
0x298b   :  { %v1502_v52 = vrot.slane %v1498_v51, 6 }
0x298d   :  { %v1504_v53 = vadd.f32 %v1502_v52, %v2705_v60 }
0x298f   :  { %2200 = vtanh.f32 %v1504_v53  ;;  %v2028_v57 = vmul.f32 -1.442695, %v1504_v53 }
0x2991   :  { %2202 = vpow2.f32 %v2028_v57 }
0x2995   :  { %v2201_v54 = vpop.eup %2200 }
0x2996   :  { %1530 = vrot.lane.b32.xlu0 %v2201_v54, %s2458_s29 }
0x2997   :  { %v2203_v55 = vpop.eup %2202 }
0x2998   :  { %v1508_v6 = vadd.f32 1.0, %v2203_v55 }
0x299a   :  { %2204 = vrcp.f32 %v1508_v6  ;;  %v1520_v1 = vand.u32 2147483648, %v1508_v6  ;;  %vm1514_vm5 = vweird.f32 %v1508_v6  ;;  %v1518_v2 = vand.u32 2147483647, %v1508_v6 }
0x299c   :  { %v1521_v4 = vor.u32 1.1754944e-38, %v1520_v1  ;;  %vm1519_vm9 = vcmp.eq.f32.partialorder %v1518_v2, 8.507059e+37 }
0x29a0   :  { %v2205_v58 = vpop.eup %2204 }
0x29a1   :  { %v1510_v59 = vmul.f32 %v2205_v58, %v1508_v6  ;;  %vm1515_vm4 = vweird.f32 %v2205_v58 }
0x29a2   :  { %vm1516_vm8 = vmor %vm1514_vm5, %vm1515_vm4 }
0x29a3   :  { %v1511_v62 = vsub.f32 1.0, %v1510_v59 }
0x29a5   :  { %v1512_v63 = vmul.f32 %v2205_v58, %v1511_v62 }
0x29a7   :  { %v1513_v0 = vadd.f32 %v2205_v58, %v1512_v63 }
0x29a9   :  { %v1517_v3 = vsel %vm1516_vm8, %v2205_v58, %v1513_v0 }
0x29aa   :  { %v1522_v7 = vsel %vm1519_vm9, %v1521_v4, %v1517_v3 }
0x29ab   :  { %v1528_v11 = vmul.f32 %v1526_v10, %v1522_v7 }
0x2a08   :  { %v1531_v5 = vpop.permute.xlu0 %1530 }
0x2a09   :  { %v1533_v8 = vmul.f32 %v1531_v5, %v1522_v7 }
0x2a0b   :  { %1535 = vrot.lane.b32.xlu1 %v1533_v8, %s2458_s29 }
0x2a7d   :  { %v1536_v12 = vpop.permute.xlu1 %1535 }
0x2a7e   :  { %v1538_v13 = vadd.f32 %v1536_v12, %v1528_v11 }
0x2a80   :  { %2206 = vtanh.f32 %v1538_v13  ;;  %v1596_v38 = vrot.slane %v1538_v13, 7 }
0x2a86   :  { %v2207_v14 = vpop.eup %2206 }
0x2a87   :  { %1541 = vrot.lane.b32.xlu2 %v2207_v14, %s2458_s29 }
0x2ae1   :  { %v1542_v15 = vpop.permute.xlu2 %1541 }
0x2ae2   :  { %v1544_v16 = vmul.f32 %v1542_v15, %v1522_v7 }
0x2ae4   :  { %v1546_v18 = vrot.slane %v1544_v16, 2  ;;  %v1896_v19 = vsel %vm709_vm1, %v1895_v17, %v1544_v16 }
0x2ae6   :  { %1547 = vrot.lane.b32.xlu0 %v1546_v18, %s2459_s3 }
0x2b58   :  { %v1548_v20 = vpop.permute.xlu0 %1547 }
0x2b59   :  { %2029 = vmatmul.msk.f32.vlgmr.msrb.gmra.mxu2 %vm156_vm6, %v1548_v20 }
0x2bdc   :  { %v1568_v21 = vpop.f32.mrf.mxu2 }
0x2bdd   :  { %v1572_v24 = vrot.slane %v1568_v21, 5 }
0x2bdf   :  { %v1574_v25 = vadd.f32 %v1572_v24, %v2705_v60 }
0x2be1   :  { %2208 = vtanh.f32 %v1574_v25  ;;  %v2030_v27 = vmul.f32 -1.442695, %v1574_v25 }
0x2be3   :  { %2210 = vpow2.f32 %v2030_v27 }
0x2be7   :  { %v2209_v26 = vpop.eup %2208 }
0x2be8   :  { %1600 = vrot.lane.b32.xlu1 %v2209_v26, %s2458_s29 }
0x2be9   :  { %v2211_v28 = vpop.eup %2210 }
0x2bea   :  { %v1578_v23 = vadd.f32 1.0, %v2211_v28 }
0x2bec   :  { %2212 = vrcp.f32 %v1578_v23  ;;  %v1590_v32 = vand.u32 2147483648, %v1578_v23  ;;  %vm1584_vm11 = vweird.f32 %v1578_v23  ;;  %v1588_v34 = vand.u32 2147483647, %v1578_v23 }
0x2bee   :  { %v1591_v36 = vor.u32 1.1754944e-38, %v1590_v32  ;;  %vm1589_vm13 = vcmp.eq.f32.partialorder %v1588_v34, 8.507059e+37 }
0x2bf2   :  { %v2213_v22 = vpop.eup %2212 }
0x2bf3   :  { %v1580_v29 = vmul.f32 %v2213_v22, %v1578_v23  ;;  %vm1585_vm15 = vweird.f32 %v2213_v22 }
0x2bf4   :  { %vm1586_vm12 = vmor %vm1584_vm11, %vm1585_vm15 }
0x2bf5   :  { %v1581_v30 = vsub.f32 1.0, %v1580_v29 }
0x2bf7   :  { %v1582_v31 = vmul.f32 %v2213_v22, %v1581_v30 }
0x2bf9   :  { %v1583_v61 = vadd.f32 %v2213_v22, %v1582_v31 }
0x2bfb   :  { %v1587_v35 = vsel %vm1586_vm12, %v2213_v22, %v1583_v61 }
0x2bfc   :  { %v1592_v9 = vsel %vm1589_vm13, %v1591_v36, %v1587_v35 }
0x2bfd   :  { %v1598_v39 = vmul.f32 %v1596_v38, %v1592_v9 }
0x2c5a   :  { %v1601_v37 = vpop.permute.xlu1 %1600 }
0x2c5b   :  { %v1603_v33 = vmul.f32 %v1601_v37, %v1592_v9 }
0x2c5d   :  { %1605 = vrot.lane.b32.xlu2 %v1603_v33, %s2458_s29 }
0x2cb7   :  { %v1606_v40 = vpop.permute.xlu2 %1605 }
0x2cb8   :  { %v1608_v42 = vadd.f32 %v1606_v40, %v1598_v39 }
0x2cba   :  { %2214 = vtanh.f32 %v1608_v42  ;;  %v1666_v7 = vrot.slane %v1608_v42, 7 }
0x2cc0   :  { %v2215_v43 = vpop.eup %2214 }
0x2cc1   :  { %1611 = vrot.lane.b32.xlu0 %v2215_v43, %s2458_s29 }
0x2d33   :  { %v1612_v45 = vpop.permute.xlu0 %1611 }
0x2d34   :  { %v1614_v46 = vmul.f32 %v1612_v45, %v1592_v9 }
0x2d36   :  { %v1616_v47 = vrot.slane %v1614_v46, 3  ;;  %v1897_v48 = vsel %vm711_vm7, %v1896_v19, %v1614_v46 }
0x2d38   :  { %1617 = vrot.lane.b32.xlu1 %v1616_v47, %s2459_s3 }
0x2daa   :  { %v1618_v49 = vpop.permute.xlu1 %1617 }
0x2dab   :  { %2031 = vmatmul.msk.f32.vlgmr.msrb.gmra.mxu3 %vm156_vm6, %v1618_v49 }
0x2e2e   :  { %v1638_v44 = vpop.f32.mrf.mxu3 }
0x2e2f   :  { %v1642_v50 = vrot.slane %v1638_v44, 4 }
0x2e31   :  { %v1644_v51 = vadd.f32 %v1642_v50, %v2705_v60 }
0x2e33   :  { %2216 = vtanh.f32 %v1644_v51  ;;  %v2032_v53 = vmul.f32 -1.442695, %v1644_v51 }
0x2e35   :  { %2218 = vpow2.f32 %v2032_v53 }
0x2e39   :  { %v2217_v52 = vpop.eup %2216 }
0x2e3a   :  { %1670 = vrot.lane.b32.xlu2 %v2217_v52, %s2458_s29 }
0x2e3b   :  { %v2219_v54 = vpop.eup %2218 }
0x2e3c   :  { %v1648_v57 = vadd.f32 1.0, %v2219_v54 }
0x2e3e   :  { %2220 = vrcp.f32 %v1648_v57  ;;  %v1660_v63 = vand.u32 2147483648, %v1648_v57  ;;  %vm1654_vm14 = vweird.f32 %v1648_v57  ;;  %v1658_v0 = vand.u32 2147483647, %v1648_v57 }
0x2e40   :  { %v1661_v2 = vor.u32 1.1754944e-38, %v1660_v63  ;;  %vm1659_vm5 = vcmp.eq.f32.partialorder %v1658_v0, 8.507059e+37 }
0x2e44   :  { %v2221_v55 = vpop.eup %2220 }
0x2e45   :  { %v1650_v6 = vmul.f32 %v2221_v55, %v1648_v57  ;;  %vm1655_vm7 = vweird.f32 %v2221_v55 }
0x2e46   :  { %vm1656_vm4 = vmor %vm1654_vm14, %vm1655_vm7 }
0x2e47   :  { %v1651_v58 = vsub.f32 1.0, %v1650_v6 }
0x2e49   :  { %v1652_v59 = vmul.f32 %v2221_v55, %v1651_v58 }
0x2e4b   :  { %v1653_v62 = vadd.f32 %v2221_v55, %v1652_v59 }
0x2e4d   :  { %v1657_v1 = vsel %vm1656_vm4, %v2221_v55, %v1653_v62 }
0x2e4e   :  { %v1662_v4 = vsel %vm1659_vm5, %v1661_v2, %v1657_v1  ;;  %vm1922_vm5 = vcmask 256000  }
0x2e4f   :  { %v1668_v8 = vmul.f32 %v1666_v7, %v1662_v4 }
0x2e94   :  { %v1671_v3 = vpop.permute.xlu2 %1670 }
0x2e95   :  { %v1673_v5 = vmul.f32 %v1671_v3, %v1662_v4 }
0x2e97   :  { %1675 = vrot.lane.b32.xlu0 %v1673_v5, %s2458_s29 }
0x2f09   :  { %v1676_v10 = vpop.permute.xlu0 %1675 }
0x2f0a   :  { %v1678_v11 = vadd.f32 %v1676_v10, %v1668_v8 }
0x2f0c   :  { %2222 = vtanh.f32 %v1678_v11  ;;  %v1736_v37 = vrot.slane %v1678_v11, 7 }
0x2f12   :  { %v2223_v12 = vpop.eup %2222 }
0x2f13   :  { %1681 = vrot.lane.b32.xlu1 %v2223_v12, %s2458_s29 }
0x2f85   :  { %v1682_v13 = vpop.permute.xlu1 %1681 }
0x2f86   :  { %v1684_v14 = vmul.f32 %v1682_v13, %v1662_v4 }
0x2f88   :  { %v1686_v15 = vrot.slane %v1684_v14, 4  ;;  %v1898_v16 = vsel %vm132_vm0, %v1897_v48, %v1684_v14 }
0x2f8a   :  { %1687 = vrot.lane.b32.xlu2 %v1686_v15, %s2459_s3 }
0x2fe4   :  { %v1688_v17 = vpop.permute.xlu2 %1687 }
0x2fe5   :  { %2033 = vmatmul.msk.f32.vlgmr.msra.gmra.mxu0 %vm156_vm6, %v1688_v17 }
0x3062   :  { %v1708_v18 = vpop.f32.mrf.mxu0 }
0x3063   :  { %v1712_v19 = vrot.slane %v1708_v18, 3 }
0x3065   :  { %v1714_v20 = vadd.f32 %v1712_v19, %v2705_v60 }
0x3067   :  { %2224 = vtanh.f32 %v1714_v20  ;;  %v2034_v24 = vmul.f32 -1.442695, %v1714_v20 }
0x3069   :  { %2226 = vpow2.f32 %v2034_v24 }
0x306d   :  { %v2225_v21 = vpop.eup %2224 }
0x306e   :  { %1740 = vrot.lane.b32.xlu0 %v2225_v21, %s2458_s29 }
0x306f   :  { %v2227_v25 = vpop.eup %2226 }
0x3070   :  { %v1718_v26 = vadd.f32 1.0, %v2227_v25 }
0x3072   :  { %2228 = vrcp.f32 %v1718_v26  ;;  %v1730_v30 = vand.u32 2147483648, %v1718_v26  ;;  %vm1724_vm8 = vweird.f32 %v1718_v26  ;;  %v1728_v31 = vand.u32 2147483647, %v1718_v26 }
0x3074   :  { %v1731_v32 = vor.u32 1.1754944e-38, %v1730_v30  ;;  %vm1729_vm15 = vcmp.eq.f32.partialorder %v1728_v31, 8.507059e+37 }
0x3078   :  { %v2229_v27 = vpop.eup %2228 }
0x3079   :  { %v1720_v28 = vmul.f32 %v2229_v27, %v1718_v26  ;;  %vm1725_vm0 = vweird.f32 %v2229_v27 }
0x307a   :  { %vm1726_vm9 = vmor %vm1724_vm8, %vm1725_vm0 }
0x307b   :  { %v1721_v23 = vsub.f32 1.0, %v1720_v28 }
0x307d   :  { %v1722_v22 = vmul.f32 %v2229_v27, %v1721_v23 }
0x307f   :  { %v1723_v29 = vadd.f32 %v2229_v27, %v1722_v22 }
0x3081   :  { %v1727_v61 = vsel %vm1726_vm9, %v2229_v27, %v1723_v29 }
0x3082   :  { %v1732_v35 = vsel %vm1729_vm15, %v1731_v32, %v1727_v61 }
0x3083   :  { %v1738_v9 = vmul.f32 %v1736_v37, %v1732_v35 }
0x30e0   :  { %v1741_v34 = vpop.permute.xlu0 %1740 }
0x30e1   :  { %v1743_v36 = vmul.f32 %v1741_v34, %v1732_v35 }
0x30e3   :  { %1745 = vrot.lane.b32.xlu1 %v1743_v36, %s2458_s29 }
0x3155   :  { %v1746_v33 = vpop.permute.xlu1 %1745 }
0x3156   :  { %v1748_v38 = vadd.f32 %v1746_v33, %v1738_v9 }
0x3158   :  { %2230 = vtanh.f32 %v1748_v38  ;;  %v1806_v3 = vrot.slane %v1748_v38, 7 }
0x315e   :  { %v2231_v39 = vpop.eup %2230 }
0x315f   :  { %1751 = vrot.lane.b32.xlu2 %v2231_v39, %s2458_s29 }
0x31b9   :  { %v1752_v40 = vpop.permute.xlu2 %1751 }
0x31ba   :  { %v1754_v42 = vmul.f32 %v1752_v40, %v1732_v35 }
0x31bc   :  { %v1756_v43 = vrot.slane %v1754_v42, 5  ;;  %v1899_v45 = vsel %vm714_vm3, %v1898_v16, %v1754_v42 }
0x31be   :  { %1757 = vrot.lane.b32.xlu0 %v1756_v43, %s2459_s3 }
0x3230   :  { %v1758_v46 = vpop.permute.xlu0 %1757 }
0x3231   :  { %2035 = vmatmul.msk.f32.vlgmr.msra.gmra.mxu1 %vm156_vm6, %v1758_v46 }
0x32ae   :  { %v1778_v47 = vpop.f32.mrf.mxu1 }
0x32af   :  { %v1782_v48 = vrot.slane %v1778_v47, 2 }
0x32b1   :  { %v1784_v49 = vadd.f32 %v1782_v48, %v2705_v60 }
0x32b3   :  { %2232 = vtanh.f32 %v1784_v49  ;;  %v2036_v50 = vmul.f32 -1.442695, %v1784_v49 }
0x32b5   :  { %2234 = vpow2.f32 %v2036_v50 }
0x32b9   :  { %v2233_v44 = vpop.eup %2232 }
0x32ba   :  { %1810 = vrot.lane.b32.xlu1 %v2233_v44, %s2458_s29 }
0x32bb   :  { %v2235_v51 = vpop.eup %2234 }
0x32bc   :  { %v1788_v52 = vadd.f32 1.0, %v2235_v51 }
0x32be   :  { %2236 = vrcp.f32 %v1788_v52  ;;  %v1800_v58 = vand.u32 2147483648, %v1788_v52  ;;  %vm1794_vm11 = vweird.f32 %v1788_v52  ;;  %v1798_v59 = vand.u32 2147483647, %v1788_v52 }
0x32c0   :  { %v1801_v63 = vor.u32 1.1754944e-38, %v1800_v58  ;;  %vm1799_vm13 = vcmp.eq.f32.partialorder %v1798_v59, 8.507059e+37 }
0x32c4   :  { %v2237_v53 = vpop.eup %2236 }
0x32c5   :  { %v1790_v54 = vmul.f32 %v2237_v53, %v1788_v52  ;;  %vm1795_vm3 = vweird.f32 %v2237_v53 }
0x32c6   :  { %vm1796_vm12 = vmor %vm1794_vm11, %vm1795_vm3 }
0x32c7   :  { %v1791_v57 = vsub.f32 1.0, %v1790_v54 }
0x32c9   :  { %v1792_v55 = vmul.f32 %v2237_v53, %v1791_v57 }
0x32cb   :  { %v1793_v6 = vadd.f32 %v2237_v53, %v1792_v55 }
0x32cd   :  { %v1797_v62 = vsel %vm1796_vm12, %v2237_v53, %v1793_v6 }
0x32ce   :  { %v1802_v1 = vsel %vm1799_vm13, %v1801_v63, %v1797_v62 }
0x32cf   :  { %v1808_v4 = vmul.f32 %v1806_v3, %v1802_v1 }
0x332c   :  { %v1811_v0 = vpop.permute.xlu1 %1810 }
0x332d   :  { %v1813_v2 = vmul.f32 %v1811_v0, %v1802_v1 }
0x332f   :  { %1815 = vrot.lane.b32.xlu2 %v1813_v2, %s2458_s29 }
0x3389   :  { %v1816_v5 = vpop.permute.xlu2 %1815 }
0x338a   :  { %v1818_v7 = vadd.f32 %v1816_v5, %v1808_v4 }
0x338c   :  { %2238 = vtanh.f32 %v1818_v7  ;;  %v1876_v32 = vrot.slane %v1818_v7, 7 }
0x3392   :  { %v2239_v8 = vpop.eup %2238 }
0x3393   :  { %1821 = vrot.lane.b32.xlu0 %v2239_v8, %s2458_s29 }
0x3405   :  { %v1822_v10 = vpop.permute.xlu0 %1821 }
0x3406   :  { %v1824_v11 = vmul.f32 %v1822_v10, %v1802_v1 }
0x3408   :  { %v1826_v12 = vrot.slane %v1824_v11, 6  ;;  %v1900_v13 = vsel %vm716_vm10, %v1899_v45, %v1824_v11 }
0x340a   :  { %1827 = vrot.lane.b32.xlu1 %v1826_v12, %s2459_s3 }
0x347c   :  { %v1828_v14 = vpop.permute.xlu1 %1827 }
0x347d   :  { %2037 = vmatmul.msk.f32.vlgmr.msra.gmra.mxu2 %vm156_vm6, %v1828_v14 }
0x3500   :  { %v1848_v15 = vpop.f32.mrf.mxu2 }
0x3501   :  { %v1852_v16 = vrot.slane %v1848_v15, 1 }
0x3503   :  { %v1854_v17 = vadd.f32 %v1852_v16, %v2705_v60 }
0x3505   :  { %2240 = vtanh.f32 %v1854_v17  ;;  %v2038_v19 = vmul.f32 -1.442695, %v1854_v17 }
0x3507   :  { %2242 = vpow2.f32 %v2038_v19 }
0x350b   :  { %v2241_v18 = vpop.eup %2240 }
0x350c   :  { %1880 = vrot.lane.b32.xlu2 %v2241_v18, %s2458_s29 }
0x350d   :  { %v2243_v20 = vpop.eup %2242 }
0x350e   :  { %v1858_v21 = vadd.f32 1.0, %v2243_v20 }
0x3510   :  { %2244 = vrcp.f32 %v1858_v21  ;;  %v1870_v23 = vand.u32 2147483648, %v1858_v21  ;;  %vm1864_vm7 = vweird.f32 %v1858_v21  ;;  %v1868_v22 = vand.u32 2147483647, %v1858_v21 }
0x3512   :  { %v1871_v29 = vor.u32 1.1754944e-38, %v1870_v23  ;;  %vm1869_vm4 = vcmp.eq.f32.partialorder %v1868_v22, 8.507059e+37 }
0x3516   :  { %v2245_v24 = vpop.eup %2244 }
0x3517   :  { %v1860_v25 = vmul.f32 %v2245_v24, %v1858_v21  ;;  %vm1865_vm10 = vweird.f32 %v2245_v24 }
0x3518   :  { %vm1866_vm14 = vmor %vm1864_vm7, %vm1865_vm10 }
0x3519   :  { %v1861_v26 = vsub.f32 1.0, %v1860_v25 }
0x351b   :  { %v1862_v27 = vmul.f32 %v2245_v24, %v1861_v26 }
0x351d   :  { %v1863_v28 = vadd.f32 %v2245_v24, %v1862_v27 }
0x351f   :  { %v1867_v60 = vsel %vm1866_vm14, %v2245_v24, %v1863_v28 }
0x3520   :  { %v1872_v31 = vsel %vm1869_vm4, %v1871_v29, %v1867_v60 }
0x3521   :  { %v1878_v34 = vmul.f32 %v1876_v32, %v1872_v31 }
0x3566   :  { %v1881_v30 = vpop.permute.xlu2 %1880 }
0x3567   :  { %v1883_v61 = vmul.f32 %v1881_v30, %v1872_v31 }
0x3569   :  { %1885 = vrot.lane.b32.xlu0 %v1883_v61, %s2458_s29 }
0x35db   :  { %v1886_v35 = vpop.permute.xlu0 %1885 }
0x35dc   :  { %v1888_v36 = vadd.f32 %v1886_v35, %v1878_v34 }
0x35de   :  { %2246 = vtanh.f32 %v1888_v36  ;;  %v1931_v37 = vrot.slane %v1888_v36, 5 }
0x35e0   :  { %v1934_v9 = vsel %vm709_vm1, %v2690_v41, %v1931_v37 }
0x35e4   :  { %v2247_v33 = vpop.eup %2246 }
0x35e5   :  { %1891 = vrot.lane.b32.xlu1 %v2247_v33, %s2458_s29 }
0x35ed   :  { %1936 = vrot.lane.b32.xlu1 %v1934_v9, %s2460_s9 }
0x3657   :  { %v1892_v38 = vpop.permute.xlu1 %1891 }
0x3658   :  { %v1894_v39 = vmul.f32 %v1892_v38, %v1872_v31 }
0x365a   :  { %v1914_v40 = vrot.slane %v1894_v39, 5  ;;  %v1901_v42 = vsel %vm718_vm2, %v1900_v13, %v1894_v39 }
0x365b   :  { %1903 = vrot.lane.b32.xlu0 %v1901_v42, %s2459_s3 }
0x365c   :  { %v1917_v43 = vsel %vm709_vm1, %v2698_v56, %v1914_v40 }
0x365d   :  { %1919 = vrot.lane.b32.xlu2 %v1917_v43, %s2459_s3 }
0x365f   :  { %v1937_v45 = vpop.permute.xlu1 %1936 }
0x3660   :  { %1939 = vst.msk [vmem:[#allocation14] sm:$0x7] %vm1922_vm5, %v1937_v45 }
0x36b7   :  { %v1920_v41 = vpop.permute.xlu2 %1919 }
0x36b8   :  { %1923 = vst.msk [vmem:[#allocation12] sm:$0x7] %vm1922_vm5, %v1920_v41 }
0x36b9   :  { %1961 = dma.vmem_to_hbm [thread:$0]  %s1957_s16, 64, %s1959_s18, [#allocation13]  }
0x36ba   :  { %1972 = dma.vmem_to_hbm [thread:$0]  %s1968_s20, 64, %s1970_s22, [#allocation13]  }
0x36cd   :  { %v1904_v56 = vpop.permute.xlu0 %1903 }
0x36ce   :  { %1906 = vst.msk [vmem:[#allocation11] sm:$0xff] %vm156_vm6, %v1904_v56 }
0x36cf   :  { %1950 = dma.vmem_to_hbm [thread:$0]  %s1946_s24, 128, %s1948_s11, [#allocation4]  }
0x36d0   :  { %2446 = dma.done.wait [#allocation4], 128  }
0x36d1   :  { %2447 = vsyncadd [#allocation4], 4294967168 }
0x36d2   :  { %2448 = dma.done.wait [#allocation13], 128  }
0x36d3   :  { %2449 = vsyncadd [#allocation13], 4294967168 }
0x36d4   :  { %1985 = vsyncpa [#allocation3], 1 }
0x36d5   :  { %1986 = vsyncpa [#allocation6], 1 }
0x36d6   :  { %1987 = vsyncpa [#allocation9], 1 }
0x36d7   :  { %1988 = vsyncpa [#allocation4], 1 }
0x36d8   :  { %1989 = vsyncpa [#allocation13], 1 }

</bundles_post_ra>
